<compile_context>
chip_gen: v7x
topology: tpu7x:2x2x1
jax: 0.10.0
libtpu: 0.0.40
codegen_flags: <defaults>
</compile_context>

<pallas_src>
import functools
import math

import jax
import jax.numpy as jnp
from jax.experimental import pallas as pl
from jax.experimental.pallas import tpu as pltpu


# ----------------------------- Pallas kernel -----------------------------

def _layernorm(z, gamma, beta, eps):
    # Biased variance, matching torch.nn.LayerNorm. All f32.
    mean = jnp.mean(z, axis=-1, keepdims=True)
    var = jnp.mean((z - mean) ** 2, axis=-1, keepdims=True)
    return (z - mean) * jax.lax.rsqrt(var + eps) * gamma + beta


def encoder_layer_kernel(x_ref, wqkv_ref, bqkv_ref, wo_ref, bo_ref,
                         g1_ref, be1_ref, w1_ref, bf1_ref, w2_ref, bf2_ref,
                         g2_ref, be2_ref, o_ref, *, num_heads, seq_len, eps):
    # x_ref: (bb*S, E) f32; weights are bf16 full blocks, biases/LN params f32.
    x = x_ref[...]                                 # (R, E) f32, R = bb*S
    R, E = x.shape
    S = seq_len
    bb = R // S
    Dh = E // num_heads

    # --- fused QKV projection over all rows (batch folded into M) ---
    # 1/sqrt(Dh) is already folded into the Q columns of wqkv/bqkv.
    qkv = jnp.dot(x.astype(jnp.bfloat16), wqkv_ref[...],
                  preferred_element_type=jnp.float32) + bqkv_ref[...]  # (R, 3E) f32
    qkv3 = qkv.reshape(bb, S, 3 * E)

    # --- multi-head attention; heads via static lane slices, batches via
    #     batched dot_general (one MXU call per head) ---
    heads = []
    for h in range(num_heads):                      # H=4: static unroll is fine
        lo = h * Dh
        qh = qkv3[:, :, lo:lo + Dh].astype(jnp.bfloat16)              # (bb,S,Dh)
        kh = qkv3[:, :, E + lo:E + lo + Dh].astype(jnp.bfloat16)
        vh = qkv3[:, :, 2 * E + lo:2 * E + lo + Dh].astype(jnp.bfloat16)
        s = jax.lax.dot_general(qh, kh, (((2,), (2,)), ((0,), (0,))),
                                preferred_element_type=jnp.float32)    # (bb,S,S)
        # softmax in f32, exact normalization
        s = s - jnp.max(s, axis=-1, keepdims=True)
        p = jnp.exp(s)
        p = p / jnp.sum(p, axis=-1, keepdims=True)
        heads.append(jax.lax.dot_general(p.astype(jnp.bfloat16), vh,
                                         (((2,), (1,)), ((0,), (0,))),
                                         preferred_element_type=jnp.float32))
    # concat heads along lanes (contiguous) -> one fused out-projection
    o = jnp.concatenate(heads, axis=-1).reshape(R, E)                  # (R, E) f32
    y = jnp.dot(o.astype(jnp.bfloat16), wo_ref[...],
                preferred_element_type=jnp.float32) + bo_ref[...]

    # --- AddNorm 1 (f32) ---
    z = _layernorm(x + y, g1_ref[...], be1_ref[...], eps)

    # --- FeedForward (ReLU) + AddNorm 2 ---
    h1 = jnp.maximum(
        jnp.dot(z.astype(jnp.bfloat16), w1_ref[...],
                preferred_element_type=jnp.float32) + bf1_ref[...], 0.0)
    f = jnp.dot(h1.astype(jnp.bfloat16), w2_ref[...],
                preferred_element_type=jnp.float32) + bf2_ref[...]
    o_ref[...] = _layernorm(z + f, g2_ref[...], be2_ref[...], eps).astype(o_ref.dtype)


# ----------------------------- wrapper -----------------------------

def encoder_layer(x, params, num_heads, eps=1e-5, batch_block=None):
    """x: (B, S, E) -> (B, S, E). One fused pallas_call for the whole layer."""
    B, S, E = x.shape
    Hd = params["ffn_w1"].shape[1]
    Dh = E // num_heads

    # How many batches each grid step processes (batch folded into matmul M).
    # TODO(synk): as B grows on v7x, pick batch_block so there are >=2 grid
    #             steps per TensorCore while keeping the M dimension large.
    bb = B if batch_block is None else batch_block
    if B % bb != 0:
        bb = 1
    rows = bb * S

    x2d = x.reshape(B * S, E)

    # Fold 1/sqrt(Dh) into the Q columns of the fused QKV weight/bias (free,
    # one-time weight transform), and ship matmul weights as bf16.
    scale_cols = jnp.concatenate([
        jnp.full((E,), 1.0 / math.sqrt(Dh), jnp.float32),
        jnp.ones((2 * E,), jnp.float32)])
    wqkv = (params["wqkv"] * scale_cols).astype(jnp.bfloat16)
    bqkv = (params["bqkv"] * scale_cols).reshape(1, -1)   # f32

    def row_f32(v):                     # 1-D f32 params -> (1, N) VMEM tiles
        return v.reshape(1, -1)

    def full2d(shape):
        return pl.BlockSpec(shape, lambda i: (0, 0))

    kern = functools.partial(encoder_layer_kernel,
                             num_heads=num_heads, seq_len=S, eps=eps)

    # Advisory cost hint for XLA scheduling around the custom call.
    flops = 2 * B * S * E * (4 * E + 2 * Hd) + 4 * B * S * S * E
    bytes_accessed = (4 * 2 * B * S * E                      # x in + out (f32)
                      + 2 * (3 * E * E + E * E + 2 * E * Hd)  # bf16 weights
                      + 4 * (3 * E + E + Hd + 5 * E))         # biases + LN params
    cost = pl.CostEstimate(flops=flops,
                           transcendentals=B * num_heads * S * S,
                           bytes_accessed=bytes_accessed)

    out2d = pl.pallas_call(
        kern,
        out_shape=jax.ShapeDtypeStruct((B * S, E), jnp.float32),
        grid=(B // bb,),
        in_specs=[
            pl.BlockSpec((rows, E), lambda i: (i, 0)),       # x (rows of B*S)
            full2d((E, 3 * E)),                              # wqkv (bf16)
            full2d((1, 3 * E)),                              # bqkv
            full2d((E, E)),                                  # wo (bf16)
            full2d((1, E)),                                  # bo
            full2d((1, E)),                                  # ln1 gamma
            full2d((1, E)),                                  # ln1 beta
            full2d((E, Hd)),                                 # ffn w1 (bf16)
            full2d((1, Hd)),                                 # ffn b1
            full2d((Hd, E)),                                 # ffn w2 (bf16)
            full2d((1, E)),                                  # ffn b2
            full2d((1, E)),                                  # ln2 gamma
            full2d((1, E)),                                  # ln2 beta
        ],
        out_specs=pl.BlockSpec((rows, E), lambda i: (i, 0)),
        compiler_params=pltpu.CompilerParams(
            dimension_semantics=("parallel",),
            vmem_limit_bytes=64 * 1024 * 1024),
        cost_estimate=cost,
    )(x2d, wqkv, bqkv,
      params["wo"].astype(jnp.bfloat16), row_f32(params["bo"]),
      row_f32(params["ln1_g"]), row_f32(params["ln1_b"]),
      params["ffn_w1"].astype(jnp.bfloat16), row_f32(params["ffn_b1"]),
      params["ffn_w2"].astype(jnp.bfloat16), row_f32(params["ffn_b2"]),
      row_f32(params["ln2_g"]), row_f32(params["ln2_b"]))

    return out2d.reshape(B, S, E)


# ----------------------------- pure-JAX reference -----------------------------

def encoder_layer_ref(x, params, num_heads, eps=1e-5):
    B, S, E = x.shape
    Dh = E // num_heads
    qkv = x @ params["wqkv"] + params["bqkv"]
    q, k, v = jnp.split(qkv, 3, axis=-1)

    def split_heads(t):
        return t.reshape(B, S, num_heads, Dh).transpose(0, 2, 1, 3)

    qh, kh, vh = split_heads(q), split_heads(k), split_heads(v)
    s = jnp.einsum("bhqd,bhkd->bhqk", qh, kh) / math.sqrt(Dh)
    p = jax.nn.softmax(s, axis=-1)
    o = jnp.einsum("bhqk,bhkd->bhqd", p, vh).transpose(0, 2, 1, 3).reshape(B, S, E)
    y = o @ params["wo"] + params["bo"]

    def ln(z, g, b):
        m = z.mean(-1, keepdims=True)
        vv = ((z - m) ** 2).mean(-1, keepdims=True)
        return (z - m) * jax.lax.rsqrt(vv + eps) * g + b

    z = ln(x + y, params["ln1_g"], params["ln1_b"])
    f = (jnp.maximum(z @ params["ffn_w1"] + params["ffn_b1"], 0.0)
         @ params["ffn_w2"] + params["ffn_b2"])
    return ln(z + f, params["ln2_g"], params["ln2_b"])


# ----------------------------- deterministic params -----------------------------

def init_params(key, embed_dim, hidden_dim):
    ks = jax.random.split(key, 6)

    def lin(k, fi, fo):
        kw, kb = jax.random.split(k)
        return (jax.random.normal(kw, (fi, fo), jnp.float32) * 0.05,
                jax.random.normal(kb, (fo,), jnp.float32) * 0.05)

    wq, bq = lin(ks[0], embed_dim, embed_dim)
    wk, bk = lin(ks[1], embed_dim, embed_dim)
    wv, bv = lin(ks[2], embed_dim, embed_dim)
    wo, bo = lin(ks[3], embed_dim, embed_dim)
    w1, b1 = lin(ks[4], embed_dim, hidden_dim)
    w2, b2 = lin(ks[5], hidden_dim, embed_dim)
    return {
        "wqkv": jnp.concatenate([wq, wk, wv], axis=1),   # (E, 3E)
        "bqkv": jnp.concatenate([bq, bk, bv], axis=0),   # (3E,)
        "wo": wo, "bo": bo,
        "ffn_w1": w1, "ffn_b1": b1,
        "ffn_w2": w2, "ffn_b2": b2,
        # LayerNorm default init: weight = 1, bias = 0
        "ln1_g": jnp.ones((embed_dim,), jnp.float32),
        "ln1_b": jnp.zeros((embed_dim,), jnp.float32),
        "ln2_g": jnp.ones((embed_dim,), jnp.float32),
        "ln2_b": jnp.zeros((embed_dim,), jnp.float32),
    }


# ----------------------------- main -----------------------------

if __name__ == "__main__":
    embed_dim = 32
    num_heads = 4
    hidden_dim = 64
    batch = 2
    seq = 8

    root = jax.random.PRNGKey(0)
    k_param, k_x = jax.random.split(root)

    params = init_params(k_param, embed_dim, hidden_dim)
    x = jax.random.normal(k_x, (batch, seq, embed_dim), jnp.float32)

    fwd = jax.jit(functools.partial(encoder_layer, num_heads=num_heads))
    out = fwd(x, params)
    jax.block_until_ready(out)

    ref = encoder_layer_ref(x, params, num_heads)

    assert out.shape == (batch, seq, embed_dim)
    assert bool(jnp.all(jnp.isfinite(out)))
    # bf16 MXU operands (f32 accumulation) vs pure-f32 reference -> relaxed tol.
    max_err = float(jnp.max(jnp.abs(out - ref)))
    assert max_err < 3e-2, f"mismatch vs reference: max abs err = {max_err}"
    print("KERNEL_OK")
</pallas_src>

<mosaic_0001>
module attributes {stable_mosaic.version = 11 : i64} {
  func.func @encoder_layer_kernel(%arg0: i32, %arg1: memref<16x32xf32, #tpu.memory_space<vmem>>, %arg2: memref<32x96xbf16, #tpu.memory_space<vmem>>, %arg3: memref<1x96xf32, #tpu.memory_space<vmem>>, %arg4: memref<32x32xbf16, #tpu.memory_space<vmem>>, %arg5: memref<1x32xf32, #tpu.memory_space<vmem>>, %arg6: memref<1x32xf32, #tpu.memory_space<vmem>>, %arg7: memref<1x32xf32, #tpu.memory_space<vmem>>, %arg8: memref<32x64xbf16, #tpu.memory_space<vmem>>, %arg9: memref<1x64xf32, #tpu.memory_space<vmem>>, %arg10: memref<64x32xbf16, #tpu.memory_space<vmem>>, %arg11: memref<1x32xf32, #tpu.memory_space<vmem>>, %arg12: memref<1x32xf32, #tpu.memory_space<vmem>>, %arg13: memref<1x32xf32, #tpu.memory_space<vmem>>, %arg14: memref<16x32xf32, #tpu.memory_space<vmem>>) attributes {dimension_semantics = [#tpu.dimension_semantics<parallel>], iteration_bounds = array<i64: 1>, scalar_prefetch = 0 : i64, scratch_operands = 0 : i64, tpu.core_type = #tpu.core_type<tc>, window_params = [{transform_indices = @transform_0, window_bounds = array<i64: 16, 32>}, {pipeline_mode = #tpu.pipeline_mode<synchronous>, transform_indices = @transform_1, window_bounds = array<i64: 32, 96>}, {pipeline_mode = #tpu.pipeline_mode<synchronous>, transform_indices = @transform_2, window_bounds = array<i64: 1, 96>}, {pipeline_mode = #tpu.pipeline_mode<synchronous>, transform_indices = @transform_3, window_bounds = array<i64: 32, 32>}, {pipeline_mode = #tpu.pipeline_mode<synchronous>, transform_indices = @transform_4, window_bounds = array<i64: 1, 32>}, {pipeline_mode = #tpu.pipeline_mode<synchronous>, transform_indices = @transform_5, window_bounds = array<i64: 1, 32>}, {pipeline_mode = #tpu.pipeline_mode<synchronous>, transform_indices = @transform_6, window_bounds = array<i64: 1, 32>}, {pipeline_mode = #tpu.pipeline_mode<synchronous>, transform_indices = @transform_7, window_bounds = array<i64: 32, 64>}, {pipeline_mode = #tpu.pipeline_mode<synchronous>, transform_indices = @transform_8, window_bounds = array<i64: 1, 64>}, {pipeline_mode = #tpu.pipeline_mode<synchronous>, transform_indices = @transform_9, window_bounds = array<i64: 64, 32>}, {pipeline_mode = #tpu.pipeline_mode<synchronous>, transform_indices = @transform_10, window_bounds = array<i64: 1, 32>}, {pipeline_mode = #tpu.pipeline_mode<synchronous>, transform_indices = @transform_11, window_bounds = array<i64: 1, 32>}, {pipeline_mode = #tpu.pipeline_mode<synchronous>, transform_indices = @transform_12, window_bounds = array<i64: 1, 32>}, {transform_indices = @transform_13, window_bounds = array<i64: 16, 32>}]} {
    %c0 = arith.constant 0 : index
    %c0_0 = arith.constant 0 : index
    %0 = vector.load %arg1[%c0, %c0_0] : memref<16x32xf32, #tpu.memory_space<vmem>>, vector<16x32xf32>
    %1 = arith.truncf %0 : vector<16x32xf32> to vector<16x32xbf16>
    %c0_1 = arith.constant 0 : index
    %c0_2 = arith.constant 0 : index
    %2 = vector.load %arg2[%c0_1, %c0_2] : memref<32x96xbf16, #tpu.memory_space<vmem>>, vector<32x96xbf16>
    %cst = arith.constant dense<0.000000e+00> : vector<16x96xf32>
    %3 = tpu.matmul %1, %2, %cst {dimension_numbers = #tpu.dot_dimension_numbers<[1], [0], [0], [1], [0, 0, 1, 1], [], []>} : vector<16x32xbf16>, vector<32x96xbf16>, vector<16x96xf32> -> vector<16x96xf32>
    %c0_3 = arith.constant 0 : index
    %c0_4 = arith.constant 0 : index
    %4 = vector.load %arg3[%c0_3, %c0_4] : memref<1x96xf32, #tpu.memory_space<vmem>>, vector<1x96xf32>
    %5 = vector.broadcast %4 : vector<1x96xf32> to vector<16x96xf32>
    %6 = arith.addf %3, %5 : vector<16x96xf32>
    %7 = vector.shape_cast %6 : vector<16x96xf32> to vector<2x8x96xf32>
    %8 = vector.extract_strided_slice %7 {offsets = [0, 0, 0], sizes = [2, 8, 8], strides = [1, 1, 1]} : vector<2x8x96xf32> to vector<2x8x8xf32>
    %9 = arith.truncf %8 : vector<2x8x8xf32> to vector<2x8x8xbf16>
    %10 = vector.extract_strided_slice %7 {offsets = [0, 0, 32], sizes = [2, 8, 8], strides = [1, 1, 1]} : vector<2x8x96xf32> to vector<2x8x8xf32>
    %11 = arith.truncf %10 : vector<2x8x8xf32> to vector<2x8x8xbf16>
    %12 = vector.extract_strided_slice %7 {offsets = [0, 0, 64], sizes = [2, 8, 8], strides = [1, 1, 1]} : vector<2x8x96xf32> to vector<2x8x8xf32>
    %13 = arith.truncf %12 : vector<2x8x8xf32> to vector<2x8x8xbf16>
    %cst_5 = arith.constant dense<0.000000e+00> : vector<2x8x8xf32>
    %14 = tpu.matmul %9, %11, %cst_5 {dimension_numbers = #tpu.dot_dimension_numbers<[2], [2], [1], [1], [0, 0, 0, 1, 1, 1], [0], [0]>} : vector<2x8x8xbf16>, vector<2x8x8xbf16>, vector<2x8x8xf32> -> vector<2x8x8xf32>
    %cst_6 = arith.constant dense<0xFF800000> : vector<2x8xf32>
    %15 = vector.multi_reduction <maximumf>, %14, %cst_6 [2] : vector<2x8x8xf32> to vector<2x8xf32>
    %16 = vector.shape_cast %15 : vector<2x8xf32> to vector<2x8x1xf32>
    %17 = vector.broadcast %16 : vector<2x8x1xf32> to vector<2x8x8xf32>
    %18 = arith.subf %14, %17 : vector<2x8x8xf32>
    %19 = math.exp %18 : vector<2x8x8xf32>
    %cst_7 = arith.constant dense<0.000000e+00> : vector<2x8xf32>
    %20 = vector.multi_reduction <add>, %19, %cst_7 [2] : vector<2x8x8xf32> to vector<2x8xf32>
    %21 = vector.shape_cast %20 : vector<2x8xf32> to vector<2x8x1xf32>
    %22 = vector.broadcast %21 : vector<2x8x1xf32> to vector<2x8x8xf32>
    %23 = arith.divf %19, %22 : vector<2x8x8xf32>
    %24 = arith.truncf %23 : vector<2x8x8xf32> to vector<2x8x8xbf16>
    %cst_8 = arith.constant dense<0.000000e+00> : vector<2x8x8xf32>
    %25 = tpu.matmul %24, %13, %cst_8 {dimension_numbers = #tpu.dot_dimension_numbers<[2], [1], [1], [2], [0, 0, 0, 1, 1, 2], [0], [0]>} : vector<2x8x8xbf16>, vector<2x8x8xbf16>, vector<2x8x8xf32> -> vector<2x8x8xf32>
    %26 = vector.extract_strided_slice %7 {offsets = [0, 0, 8], sizes = [2, 8, 8], strides = [1, 1, 1]} : vector<2x8x96xf32> to vector<2x8x8xf32>
    %27 = arith.truncf %26 : vector<2x8x8xf32> to vector<2x8x8xbf16>
    %28 = vector.extract_strided_slice %7 {offsets = [0, 0, 40], sizes = [2, 8, 8], strides = [1, 1, 1]} : vector<2x8x96xf32> to vector<2x8x8xf32>
    %29 = arith.truncf %28 : vector<2x8x8xf32> to vector<2x8x8xbf16>
    %30 = vector.extract_strided_slice %7 {offsets = [0, 0, 72], sizes = [2, 8, 8], strides = [1, 1, 1]} : vector<2x8x96xf32> to vector<2x8x8xf32>
    %31 = arith.truncf %30 : vector<2x8x8xf32> to vector<2x8x8xbf16>
    %cst_9 = arith.constant dense<0.000000e+00> : vector<2x8x8xf32>
    %32 = tpu.matmul %27, %29, %cst_9 {dimension_numbers = #tpu.dot_dimension_numbers<[2], [2], [1], [1], [0, 0, 0, 1, 1, 1], [0], [0]>} : vector<2x8x8xbf16>, vector<2x8x8xbf16>, vector<2x8x8xf32> -> vector<2x8x8xf32>
    %cst_10 = arith.constant dense<0xFF800000> : vector<2x8xf32>
    %33 = vector.multi_reduction <maximumf>, %32, %cst_10 [2] : vector<2x8x8xf32> to vector<2x8xf32>
    %34 = vector.shape_cast %33 : vector<2x8xf32> to vector<2x8x1xf32>
    %35 = vector.broadcast %34 : vector<2x8x1xf32> to vector<2x8x8xf32>
    %36 = arith.subf %32, %35 : vector<2x8x8xf32>
    %37 = math.exp %36 : vector<2x8x8xf32>
    %cst_11 = arith.constant dense<0.000000e+00> : vector<2x8xf32>
    %38 = vector.multi_reduction <add>, %37, %cst_11 [2] : vector<2x8x8xf32> to vector<2x8xf32>
    %39 = vector.shape_cast %38 : vector<2x8xf32> to vector<2x8x1xf32>
    %40 = vector.broadcast %39 : vector<2x8x1xf32> to vector<2x8x8xf32>
    %41 = arith.divf %37, %40 : vector<2x8x8xf32>
    %42 = arith.truncf %41 : vector<2x8x8xf32> to vector<2x8x8xbf16>
    %cst_12 = arith.constant dense<0.000000e+00> : vector<2x8x8xf32>
    %43 = tpu.matmul %42, %31, %cst_12 {dimension_numbers = #tpu.dot_dimension_numbers<[2], [1], [1], [2], [0, 0, 0, 1, 1, 2], [0], [0]>} : vector<2x8x8xbf16>, vector<2x8x8xbf16>, vector<2x8x8xf32> -> vector<2x8x8xf32>
    %44 = vector.extract_strided_slice %7 {offsets = [0, 0, 16], sizes = [2, 8, 8], strides = [1, 1, 1]} : vector<2x8x96xf32> to vector<2x8x8xf32>
    %45 = arith.truncf %44 : vector<2x8x8xf32> to vector<2x8x8xbf16>
    %46 = vector.extract_strided_slice %7 {offsets = [0, 0, 48], sizes = [2, 8, 8], strides = [1, 1, 1]} : vector<2x8x96xf32> to vector<2x8x8xf32>
    %47 = arith.truncf %46 : vector<2x8x8xf32> to vector<2x8x8xbf16>
    %48 = vector.extract_strided_slice %7 {offsets = [0, 0, 80], sizes = [2, 8, 8], strides = [1, 1, 1]} : vector<2x8x96xf32> to vector<2x8x8xf32>
    %49 = arith.truncf %48 : vector<2x8x8xf32> to vector<2x8x8xbf16>
    %cst_13 = arith.constant dense<0.000000e+00> : vector<2x8x8xf32>
    %50 = tpu.matmul %45, %47, %cst_13 {dimension_numbers = #tpu.dot_dimension_numbers<[2], [2], [1], [1], [0, 0, 0, 1, 1, 1], [0], [0]>} : vector<2x8x8xbf16>, vector<2x8x8xbf16>, vector<2x8x8xf32> -> vector<2x8x8xf32>
    %cst_14 = arith.constant dense<0xFF800000> : vector<2x8xf32>
    %51 = vector.multi_reduction <maximumf>, %50, %cst_14 [2] : vector<2x8x8xf32> to vector<2x8xf32>
    %52 = vector.shape_cast %51 : vector<2x8xf32> to vector<2x8x1xf32>
    %53 = vector.broadcast %52 : vector<2x8x1xf32> to vector<2x8x8xf32>
    %54 = arith.subf %50, %53 : vector<2x8x8xf32>
    %55 = math.exp %54 : vector<2x8x8xf32>
    %cst_15 = arith.constant dense<0.000000e+00> : vector<2x8xf32>
    %56 = vector.multi_reduction <add>, %55, %cst_15 [2] : vector<2x8x8xf32> to vector<2x8xf32>
    %57 = vector.shape_cast %56 : vector<2x8xf32> to vector<2x8x1xf32>
    %58 = vector.broadcast %57 : vector<2x8x1xf32> to vector<2x8x8xf32>
    %59 = arith.divf %55, %58 : vector<2x8x8xf32>
    %60 = arith.truncf %59 : vector<2x8x8xf32> to vector<2x8x8xbf16>
    %cst_16 = arith.constant dense<0.000000e+00> : vector<2x8x8xf32>
    %61 = tpu.matmul %60, %49, %cst_16 {dimension_numbers = #tpu.dot_dimension_numbers<[2], [1], [1], [2], [0, 0, 0, 1, 1, 2], [0], [0]>} : vector<2x8x8xbf16>, vector<2x8x8xbf16>, vector<2x8x8xf32> -> vector<2x8x8xf32>
    %62 = vector.extract_strided_slice %7 {offsets = [0, 0, 24], sizes = [2, 8, 8], strides = [1, 1, 1]} : vector<2x8x96xf32> to vector<2x8x8xf32>
    %63 = arith.truncf %62 : vector<2x8x8xf32> to vector<2x8x8xbf16>
    %64 = vector.extract_strided_slice %7 {offsets = [0, 0, 56], sizes = [2, 8, 8], strides = [1, 1, 1]} : vector<2x8x96xf32> to vector<2x8x8xf32>
    %65 = arith.truncf %64 : vector<2x8x8xf32> to vector<2x8x8xbf16>
    %66 = vector.extract_strided_slice %7 {offsets = [0, 0, 88], sizes = [2, 8, 8], strides = [1, 1, 1]} : vector<2x8x96xf32> to vector<2x8x8xf32>
    %67 = arith.truncf %66 : vector<2x8x8xf32> to vector<2x8x8xbf16>
    %cst_17 = arith.constant dense<0.000000e+00> : vector<2x8x8xf32>
    %68 = tpu.matmul %63, %65, %cst_17 {dimension_numbers = #tpu.dot_dimension_numbers<[2], [2], [1], [1], [0, 0, 0, 1, 1, 1], [0], [0]>} : vector<2x8x8xbf16>, vector<2x8x8xbf16>, vector<2x8x8xf32> -> vector<2x8x8xf32>
    %cst_18 = arith.constant dense<0xFF800000> : vector<2x8xf32>
    %69 = vector.multi_reduction <maximumf>, %68, %cst_18 [2] : vector<2x8x8xf32> to vector<2x8xf32>
    %70 = vector.shape_cast %69 : vector<2x8xf32> to vector<2x8x1xf32>
    %71 = vector.broadcast %70 : vector<2x8x1xf32> to vector<2x8x8xf32>
    %72 = arith.subf %68, %71 : vector<2x8x8xf32>
    %73 = math.exp %72 : vector<2x8x8xf32>
    %cst_19 = arith.constant dense<0.000000e+00> : vector<2x8xf32>
    %74 = vector.multi_reduction <add>, %73, %cst_19 [2] : vector<2x8x8xf32> to vector<2x8xf32>
    %75 = vector.shape_cast %74 : vector<2x8xf32> to vector<2x8x1xf32>
    %76 = vector.broadcast %75 : vector<2x8x1xf32> to vector<2x8x8xf32>
    %77 = arith.divf %73, %76 : vector<2x8x8xf32>
    %78 = arith.truncf %77 : vector<2x8x8xf32> to vector<2x8x8xbf16>
    %cst_20 = arith.constant dense<0.000000e+00> : vector<2x8x8xf32>
    %79 = tpu.matmul %78, %67, %cst_20 {dimension_numbers = #tpu.dot_dimension_numbers<[2], [1], [1], [2], [0, 0, 0, 1, 1, 2], [0], [0]>} : vector<2x8x8xbf16>, vector<2x8x8xbf16>, vector<2x8x8xf32> -> vector<2x8x8xf32>
    %80 = tpu.concatenate %25, %43, %61, %79 in 2 : vector<2x8x8xf32>, vector<2x8x8xf32>, vector<2x8x8xf32>, vector<2x8x8xf32> -> vector<2x8x32xf32>
    %81 = vector.shape_cast %80 : vector<2x8x32xf32> to vector<16x32xf32>
    %82 = arith.truncf %81 : vector<16x32xf32> to vector<16x32xbf16>
    %c0_21 = arith.constant 0 : index
    %c0_22 = arith.constant 0 : index
    %83 = vector.load %arg4[%c0_21, %c0_22] : memref<32x32xbf16, #tpu.memory_space<vmem>>, vector<32x32xbf16>
    %cst_23 = arith.constant dense<0.000000e+00> : vector<16x32xf32>
    %84 = tpu.matmul %82, %83, %cst_23 {dimension_numbers = #tpu.dot_dimension_numbers<[1], [0], [0], [1], [0, 0, 1, 1], [], []>} : vector<16x32xbf16>, vector<32x32xbf16>, vector<16x32xf32> -> vector<16x32xf32>
    %c0_24 = arith.constant 0 : index
    %c0_25 = arith.constant 0 : index
    %85 = vector.load %arg5[%c0_24, %c0_25] : memref<1x32xf32, #tpu.memory_space<vmem>>, vector<1x32xf32>
    %86 = vector.broadcast %85 : vector<1x32xf32> to vector<16x32xf32>
    %87 = arith.addf %84, %86 : vector<16x32xf32>
    %88 = arith.addf %0, %87 : vector<16x32xf32>
    %c0_26 = arith.constant 0 : index
    %c0_27 = arith.constant 0 : index
    %89 = vector.load %arg6[%c0_26, %c0_27] : memref<1x32xf32, #tpu.memory_space<vmem>>, vector<1x32xf32>
    %c0_28 = arith.constant 0 : index
    %c0_29 = arith.constant 0 : index
    %90 = vector.load %arg7[%c0_28, %c0_29] : memref<1x32xf32, #tpu.memory_space<vmem>>, vector<1x32xf32>
    %cst_30 = arith.constant dense<0.000000e+00> : vector<16xf32>
    %91 = vector.multi_reduction <add>, %88, %cst_30 [1] : vector<16x32xf32> to vector<16xf32>
    %92 = vector.shape_cast %91 : vector<16xf32> to vector<16x1xf32>
    %cst_31 = arith.constant 3.200000e+01 : f32
    %93 = vector.broadcast %cst_31 : f32 to vector<16x1xf32>
    %94 = arith.divf %92, %93 : vector<16x1xf32>
    %95 = vector.broadcast %94 : vector<16x1xf32> to vector<16x32xf32>
    %96 = arith.subf %88, %95 : vector<16x32xf32>
    %97 = arith.mulf %96, %96 : vector<16x32xf32>
    %cst_32 = arith.constant dense<0.000000e+00> : vector<16xf32>
    %98 = vector.multi_reduction <add>, %97, %cst_32 [1] : vector<16x32xf32> to vector<16xf32>
    %99 = vector.shape_cast %98 : vector<16xf32> to vector<16x1xf32>
    %cst_33 = arith.constant 3.200000e+01 : f32
    %100 = vector.broadcast %cst_33 : f32 to vector<16x1xf32>
    %101 = arith.divf %99, %100 : vector<16x1xf32>
    %102 = vector.broadcast %94 : vector<16x1xf32> to vector<16x32xf32>
    %103 = arith.subf %88, %102 : vector<16x32xf32>
    %cst_34 = arith.constant 9.99999974E-6 : f32
    %104 = vector.broadcast %cst_34 : f32 to vector<16x1xf32>
    %105 = arith.addf %101, %104 : vector<16x1xf32>
    %106 = math.rsqrt %105 : vector<16x1xf32>
    %107 = vector.broadcast %106 : vector<16x1xf32> to vector<16x32xf32>
    %108 = arith.mulf %103, %107 : vector<16x32xf32>
    %109 = vector.broadcast %89 : vector<1x32xf32> to vector<16x32xf32>
    %110 = arith.mulf %108, %109 : vector<16x32xf32>
    %111 = vector.broadcast %90 : vector<1x32xf32> to vector<16x32xf32>
    %112 = arith.addf %110, %111 : vector<16x32xf32>
    %113 = arith.truncf %112 : vector<16x32xf32> to vector<16x32xbf16>
    %c0_35 = arith.constant 0 : index
    %c0_36 = arith.constant 0 : index
    %114 = vector.load %arg8[%c0_35, %c0_36] : memref<32x64xbf16, #tpu.memory_space<vmem>>, vector<32x64xbf16>
    %cst_37 = arith.constant dense<0.000000e+00> : vector<16x64xf32>
    %115 = tpu.matmul %113, %114, %cst_37 {dimension_numbers = #tpu.dot_dimension_numbers<[1], [0], [0], [1], [0, 0, 1, 1], [], []>} : vector<16x32xbf16>, vector<32x64xbf16>, vector<16x64xf32> -> vector<16x64xf32>
    %c0_38 = arith.constant 0 : index
    %c0_39 = arith.constant 0 : index
    %116 = vector.load %arg9[%c0_38, %c0_39] : memref<1x64xf32, #tpu.memory_space<vmem>>, vector<1x64xf32>
    %117 = vector.broadcast %116 : vector<1x64xf32> to vector<16x64xf32>
    %118 = arith.addf %115, %117 : vector<16x64xf32>
    %cst_40 = arith.constant 0.000000e+00 : f32
    %119 = vector.broadcast %cst_40 : f32 to vector<16x64xf32>
    %120 = arith.maximumf %118, %119 : vector<16x64xf32>
    %121 = arith.truncf %120 : vector<16x64xf32> to vector<16x64xbf16>
    %c0_41 = arith.constant 0 : index
    %c0_42 = arith.constant 0 : index
    %122 = vector.load %arg10[%c0_41, %c0_42] : memref<64x32xbf16, #tpu.memory_space<vmem>>, vector<64x32xbf16>
    %cst_43 = arith.constant dense<0.000000e+00> : vector<16x32xf32>
    %123 = tpu.matmul %121, %122, %cst_43 {dimension_numbers = #tpu.dot_dimension_numbers<[1], [0], [0], [1], [0, 0, 1, 1], [], []>} : vector<16x64xbf16>, vector<64x32xbf16>, vector<16x32xf32> -> vector<16x32xf32>
    %c0_44 = arith.constant 0 : index
    %c0_45 = arith.constant 0 : index
    %124 = vector.load %arg11[%c0_44, %c0_45] : memref<1x32xf32, #tpu.memory_space<vmem>>, vector<1x32xf32>
    %125 = vector.broadcast %124 : vector<1x32xf32> to vector<16x32xf32>
    %126 = arith.addf %123, %125 : vector<16x32xf32>
    %127 = arith.addf %112, %126 : vector<16x32xf32>
    %c0_46 = arith.constant 0 : index
    %c0_47 = arith.constant 0 : index
    %128 = vector.load %arg12[%c0_46, %c0_47] : memref<1x32xf32, #tpu.memory_space<vmem>>, vector<1x32xf32>
    %c0_48 = arith.constant 0 : index
    %c0_49 = arith.constant 0 : index
    %129 = vector.load %arg13[%c0_48, %c0_49] : memref<1x32xf32, #tpu.memory_space<vmem>>, vector<1x32xf32>
    %cst_50 = arith.constant dense<0.000000e+00> : vector<16xf32>
    %130 = vector.multi_reduction <add>, %127, %cst_50 [1] : vector<16x32xf32> to vector<16xf32>
    %131 = vector.shape_cast %130 : vector<16xf32> to vector<16x1xf32>
    %cst_51 = arith.constant 3.200000e+01 : f32
    %132 = vector.broadcast %cst_51 : f32 to vector<16x1xf32>
    %133 = arith.divf %131, %132 : vector<16x1xf32>
    %134 = vector.broadcast %133 : vector<16x1xf32> to vector<16x32xf32>
    %135 = arith.subf %127, %134 : vector<16x32xf32>
    %136 = arith.mulf %135, %135 : vector<16x32xf32>
    %cst_52 = arith.constant dense<0.000000e+00> : vector<16xf32>
    %137 = vector.multi_reduction <add>, %136, %cst_52 [1] : vector<16x32xf32> to vector<16xf32>
    %138 = vector.shape_cast %137 : vector<16xf32> to vector<16x1xf32>
    %cst_53 = arith.constant 3.200000e+01 : f32
    %139 = vector.broadcast %cst_53 : f32 to vector<16x1xf32>
    %140 = arith.divf %138, %139 : vector<16x1xf32>
    %141 = vector.broadcast %133 : vector<16x1xf32> to vector<16x32xf32>
    %142 = arith.subf %127, %141 : vector<16x32xf32>
    %cst_54 = arith.constant 9.99999974E-6 : f32
    %143 = vector.broadcast %cst_54 : f32 to vector<16x1xf32>
    %144 = arith.addf %140, %143 : vector<16x1xf32>
    %145 = math.rsqrt %144 : vector<16x1xf32>
    %146 = vector.broadcast %145 : vector<16x1xf32> to vector<16x32xf32>
    %147 = arith.mulf %142, %146 : vector<16x32xf32>
    %148 = vector.broadcast %128 : vector<1x32xf32> to vector<16x32xf32>
    %149 = arith.mulf %147, %148 : vector<16x32xf32>
    %150 = vector.broadcast %129 : vector<1x32xf32> to vector<16x32xf32>
    %151 = arith.addf %149, %150 : vector<16x32xf32>
    %c0_55 = arith.constant 0 : index
    %c0_56 = arith.constant 0 : index
    %152 = vector.load %arg14[%c0_55, %c0_56] : memref<16x32xf32, #tpu.memory_space<vmem>>, vector<16x32xf32>
    tpu.vector_store %arg14[%c0_55, %c0_56], %151 {strides = array<i32>} : memref<16x32xf32, #tpu.memory_space<vmem>>, vector<16x32xf32>,
    return
  }
  func.func @transform_0(%arg0: i32) -> (i32, i32) {
    %c0_i32 = arith.constant 0 : i32
    %c0_i32_0 = arith.constant 0 : i32
    return %arg0, %c0_i32 : i32, i32
  }
  func.func @transform_1(%arg0: i32) -> (i32, i32) {
    %c0_i32 = arith.constant 0 : i32
    %c0_i32_0 = arith.constant 0 : i32
    %c0_i32_1 = arith.constant 0 : i32
    return %c0_i32, %c0_i32_0 : i32, i32
  }
  func.func @transform_2(%arg0: i32) -> (i32, i32) {
    %c0_i32 = arith.constant 0 : i32
    %c0_i32_0 = arith.constant 0 : i32
    %c0_i32_1 = arith.constant 0 : i32
    return %c0_i32, %c0_i32_0 : i32, i32
  }
  func.func @transform_3(%arg0: i32) -> (i32, i32) {
    %c0_i32 = arith.constant 0 : i32
    %c0_i32_0 = arith.constant 0 : i32
    %c0_i32_1 = arith.constant 0 : i32
    return %c0_i32, %c0_i32_0 : i32, i32
  }
  func.func @transform_4(%arg0: i32) -> (i32, i32) {
    %c0_i32 = arith.constant 0 : i32
    %c0_i32_0 = arith.constant 0 : i32
    %c0_i32_1 = arith.constant 0 : i32
    return %c0_i32, %c0_i32_0 : i32, i32
  }
  func.func @transform_5(%arg0: i32) -> (i32, i32) {
    %c0_i32 = arith.constant 0 : i32
    %c0_i32_0 = arith.constant 0 : i32
    %c0_i32_1 = arith.constant 0 : i32
    return %c0_i32, %c0_i32_0 : i32, i32
  }
  func.func @transform_6(%arg0: i32) -> (i32, i32) {
    %c0_i32 = arith.constant 0 : i32
    %c0_i32_0 = arith.constant 0 : i32
    %c0_i32_1 = arith.constant 0 : i32
    return %c0_i32, %c0_i32_0 : i32, i32
  }
  func.func @transform_7(%arg0: i32) -> (i32, i32) {
    %c0_i32 = arith.constant 0 : i32
    %c0_i32_0 = arith.constant 0 : i32
    %c0_i32_1 = arith.constant 0 : i32
    return %c0_i32, %c0_i32_0 : i32, i32
  }
  func.func @transform_8(%arg0: i32) -> (i32, i32) {
    %c0_i32 = arith.constant 0 : i32
    %c0_i32_0 = arith.constant 0 : i32
    %c0_i32_1 = arith.constant 0 : i32
    return %c0_i32, %c0_i32_0 : i32, i32
  }
  func.func @transform_9(%arg0: i32) -> (i32, i32) {
    %c0_i32 = arith.constant 0 : i32
    %c0_i32_0 = arith.constant 0 : i32
    %c0_i32_1 = arith.constant 0 : i32
    return %c0_i32, %c0_i32_0 : i32, i32
  }
  func.func @transform_10(%arg0: i32) -> (i32, i32) {
    %c0_i32 = arith.constant 0 : i32
    %c0_i32_0 = arith.constant 0 : i32
    %c0_i32_1 = arith.constant 0 : i32
    return %c0_i32, %c0_i32_0 : i32, i32
  }
  func.func @transform_11(%arg0: i32) -> (i32, i32) {
    %c0_i32 = arith.constant 0 : i32
    %c0_i32_0 = arith.constant 0 : i32
    %c0_i32_1 = arith.constant 0 : i32
    return %c0_i32, %c0_i32_0 : i32, i32
  }
  func.func @transform_12(%arg0: i32) -> (i32, i32) {
    %c0_i32 = arith.constant 0 : i32
    %c0_i32_0 = arith.constant 0 : i32
    %c0_i32_1 = arith.constant 0 : i32
    return %c0_i32, %c0_i32_0 : i32, i32
  }
  func.func @transform_13(%arg0: i32) -> (i32, i32) {
    %c0_i32 = arith.constant 0 : i32
    %c0_i32_0 = arith.constant 0 : i32
    return %arg0, %c0_i32 : i32, i32
  }
}

</mosaic_0001>

<bundles_post_ra>
// kernel: encoder_layer.1
= control target key start
LH: loop header
LB: loop body
LE: loop exit
PB: predicated region body
PF: predicated region fallthrough
CT: control target
= control target key end

     0   :  { %18 = vsyncpa [#allocation3], 0  ;;  %s2640_s0 = inlined_call_operand.hbm [shape: f32[16,32], index: 0, kind: input, shape index: {}]   ;;  %s2641_s1 = inlined_call_operand.hbm [shape: bf16[32,96], index: 1, kind: input, shape index: {}]   ;;  %s2642_s2 = inlined_call_operand.hbm [shape: f32[1,96], index: 2, kind: input, shape index: {}]   ;;  %s2643_s3 = inlined_call_operand.hbm [shape: bf16[32,32], index: 3, kind: input, shape index: {}]   ;;  %s2644_s4 = inlined_call_operand.hbm [shape: f32[1,32], index: 4, kind: input, shape index: {}]   ;;  %s2645_s5 = inlined_call_operand.hbm [shape: f32[1,32], index: 5, kind: input, shape index: {}]   ;;  %s2646_s6 = inlined_call_operand.hbm [shape: f32[1,32], index: 6, kind: input, shape index: {}]   ;;  %s2647_s7 = inlined_call_operand.hbm [shape: bf16[32,64], index: 7, kind: input, shape index: {}]   ;;  %s2648_s8 = inlined_call_operand.hbm [shape: f32[1,64], index: 8, kind: input, shape index: {}]   ;;  %s2649_s9 = inlined_call_operand.hbm [shape: bf16[64,32], index: 9, kind: input, shape index: {}]   ;;  %s2650_s10 = inlined_call_operand.hbm [shape: f32[1,32], index: 10, kind: input, shape index: {}]   ;;  %s2651_s11 = inlined_call_operand.hbm [shape: f32[1,32], index: 11, kind: input, shape index: {}]   ;;  %s2652_s12 = inlined_call_operand.hbm [shape: f32[1,32], index: 12, kind: input, shape index: {}]   ;;  %s2653_s13 = inlined_call_operand.hbm [shape: f32[16,32], index: 13, kind: output, shape index: {}]  }
   0x1   :  { %19 = vsyncpa [#allocation6], 0 }
   0x2   :  { %20 = vsyncpa [#allocation9], 0 }
   0x3   :  { %21 = vsyncpa [#allocation12], 0 }
   0x4   :  { %22 = vsyncpa [#allocation15], 0 }
   0x5   :  { %23 = vsyncpa [#allocation18], 0 }
   0x6   :  { %24 = vsyncpa [#allocation21], 0 }
   0x7   :  { %25 = vsyncpa [#allocation4], 0  ;;  %s2169_s25 = smov [#allocation5]   ;;  %s1845_s29 = scalar_lea.hbm %s2641_s1, 256 }
   0x8   :  { %s43_s26 = sshll.u32 %s2169_s25, 4  ;;  %p1846_p0 = scmp.ne.s32.totalorder %s2641_s1, %s1845_s29  ;;  %s44_s26 = int_to_ptr.vmem [resolvable:$true] %s43_s26 }
   0x9   :  { %p1849_p1 = scmp.lt.u32.totalorder %s1845_s29, %s2641_s1 }
   0xb   :  { %p1851_p2 = pnand %p1849_p1, %p1846_p0 }
   0xd   :  { %1854 = shalt.err (!%p1851_p2)
}
   0xe   :  { %s1855_s17 = scalar_lea.vmem %s44_s26, 256  ;;  %p1860_p4 = scmp.lt.s32.totalorder %s44_s26, %s44_s26 }
   0xf   :  { %p1856_p3 = scmp.ne.s32.totalorder %s44_s26, %s1855_s17  ;;  %p1861_p5 = scmp.lt.s32.totalorder %s1855_s17, %s1855_s17 }
  0x11   :  { %p1862_p6 = por %p1861_p5, %p1860_p4 }
  0x13   :  { %p1863_p7 = pnand %p1862_p6, %p1856_p3 }
  0x15   :  { %1866 = shalt.err (!%p1863_p7)
}
  0x16   :  { %s2170_s18 = smov 64   ;;  %s2171_s19 = smov 4  }
  0x17   :  { %49 = dma.hbm_to_vmem [thread:$0]  %s2641_s1, 256, %s44_s26, [#allocation6], %s2170_s18, %s2170_s18, %s2171_s19  }
  0x18   :  { %s2172_s22 = smov [#allocation8]   ;;  %s2173_s24 = smov [#allocation11]  }
  0x19   :  { %s65_s23 = sshll.u32 %s2172_s22, 4  ;;  %s88_s25 = sshll.u32 %s2173_s24, 4  ;;  %s66_s23 = int_to_ptr.vmem [resolvable:$true] %s65_s23  ;;  %s89_s25 = int_to_ptr.vmem [resolvable:$true] %s88_s25 }
  0x1a   :  { %s1867_s29 = scalar_lea.hbm %s2643_s3, 256 }
  0x1b   :  { %p1868_p8 = scmp.ne.s32.totalorder %s2643_s3, %s1867_s29  ;;  %p1871_p9 = scmp.lt.u32.totalorder %s1867_s29, %s2643_s3 }
  0x1d   :  { %p1873_p10 = pnand %p1871_p9, %p1868_p8 }
  0x1f   :  { %1876 = shalt.err (!%p1873_p10)
}
  0x20   :  { %s1877_s1 = scalar_lea.vmem %s66_s23, 256  ;;  %p1882_p12 = scmp.lt.s32.totalorder %s66_s23, %s66_s23 }
  0x21   :  { %p1878_p11 = scmp.ne.s32.totalorder %s66_s23, %s1877_s1  ;;  %p1883_p13 = scmp.lt.s32.totalorder %s1877_s1, %s1877_s1 }
  0x23   :  { %p1884_p0 = por %p1883_p13, %p1882_p12 }
  0x25   :  { %p1885_p1 = pnand %p1884_p0, %p1878_p11 }
  0x27   :  { %1888 = shalt.err (!%p1885_p1)
}
  0x28   :  { %71 = dma.hbm_to_vmem [thread:$0]  %s2643_s3, 256, %s66_s23, [#allocation9], %s2170_s18, %s2170_s18, %s2171_s19  }
  0x29   :  { %s1889_s22 = scalar_lea.hbm %s2645_s5, 16 }
  0x2a   :  { %p1890_p2 = scmp.ne.s32.totalorder %s2645_s5, %s1889_s22  ;;  %p1893_p3 = scmp.lt.u32.totalorder %s1889_s22, %s2645_s5 }
  0x2c   :  { %p1895_p4 = pnand %p1893_p3, %p1890_p2 }
  0x2e   :  { %1898 = shalt.err (!%p1895_p4)
}
  0x2f   :  { %s1899_s30 = scalar_lea.vmem %s89_s25, 16  ;;  %s1903_s14 = scalar_lea.vmem %s89_s25, 32 }
  0x30   :  { %p1900_p5 = scmp.ne.s32.totalorder %s89_s25, %s1899_s30  ;;  %p1904_p6 = scmp.lt.s32.totalorder %s89_s25, %s89_s25 }
  0x31   :  { %p1905_p7 = scmp.lt.s32.totalorder %s1903_s14, %s1899_s30 }
  0x33   :  { %p1906_p8 = por %p1905_p7, %p1904_p6 }
  0x35   :  { %p1907_p9 = pnand %p1906_p8, %p1900_p5 }
  0x37   :  { %1910 = shalt.err (!%p1907_p9)
}
  0x38   :  { %91 = dma.hbm_to_vmem [thread:$0]  %s2645_s5, 16, %s89_s25, [#allocation12]  }
  0x39   :  { %s2174_s15 = smov [#allocation14]   ;;  %s2175_s1 = smov [#allocation17]  }
  0x3a   :  { %s107_s16 = sshll.u32 %s2174_s15, 4  ;;  %s129_s26 = sshll.u32 %s2175_s1, 4  ;;  %s108_s16 = int_to_ptr.vmem [resolvable:$true] %s107_s16  ;;  %s130_s26 = int_to_ptr.vmem [resolvable:$true] %s129_s26 }
  0x3b   :  { %s1911_s21 = scalar_lea.hbm %s2647_s7, 256 }
  0x3c   :  { %p1912_p10 = scmp.ne.s32.totalorder %s2647_s7, %s1911_s21  ;;  %p1915_p11 = scmp.lt.u32.totalorder %s1911_s21, %s2647_s7 }
  0x3e   :  { %p1917_p12 = pnand %p1915_p11, %p1912_p10 }
  0x40   :  { %1920 = shalt.err (!%p1917_p12)
}
  0x41   :  { %s1921_s5 = scalar_lea.vmem %s108_s16, 256  ;;  %p1926_p0 = scmp.lt.s32.totalorder %s108_s16, %s108_s16 }
  0x42   :  { %p1922_p13 = scmp.ne.s32.totalorder %s108_s16, %s1921_s5  ;;  %p1927_p1 = scmp.lt.s32.totalorder %s1921_s5, %s1921_s5 }
  0x44   :  { %p1928_p2 = por %p1927_p1, %p1926_p0 }
  0x46   :  { %p1929_p3 = pnand %p1928_p2, %p1922_p13 }
  0x48   :  { %1932 = shalt.err (!%p1929_p3)
}
  0x49   :  { %113 = dma.hbm_to_vmem [thread:$0]  %s2647_s7, 256, %s108_s16, [#allocation15], %s2170_s18, %s2170_s18, %s2171_s19  }
  0x4a   :  { %s1933_s3 = scalar_lea.hbm %s2649_s9, 512 }
  0x4b   :  { %p1934_p4 = scmp.ne.s32.totalorder %s2649_s9, %s1933_s3  ;;  %p1937_p5 = scmp.lt.u32.totalorder %s1933_s3, %s2649_s9 }
  0x4d   :  { %p1939_p6 = pnand %p1937_p5, %p1934_p4 }
  0x4f   :  { %1942 = shalt.err (!%p1939_p6)
}
  0x50   :  { %s1943_s20 = scalar_lea.vmem %s130_s26, 512  ;;  %p1948_p8 = scmp.lt.s32.totalorder %s130_s26, %s130_s26 }
  0x51   :  { %p1944_p7 = scmp.ne.s32.totalorder %s130_s26, %s1943_s20  ;;  %p1949_p9 = scmp.lt.s32.totalorder %s1943_s20, %s1943_s20 }
  0x53   :  { %p1950_p10 = por %p1949_p9, %p1948_p8 }
  0x55   :  { %p1951_p11 = pnand %p1950_p10, %p1944_p7 }
  0x57   :  { %1954 = shalt.err (!%p1951_p11)
}
  0x58   :  { %135 = dma.hbm_to_vmem [thread:$0]  %s2649_s9, 512, %s130_s26, [#allocation18], %s2170_s18, %s2170_s18, %s2171_s19  }
  0x59   :  { %s2176_s21 = smov [#allocation20]   ;;  %s2177_s24 = smov [#allocation2]  }
  0x5a   :  { %s152_s22 = sshll.u32 %s2176_s21, 4  ;;  %s31_s27 = sshll.u32 %s2177_s24, 4  ;;  %s153_s22 = int_to_ptr.vmem [resolvable:$true] %s152_s22  ;;  %s32_s27 = int_to_ptr.vmem [resolvable:$true] %s31_s27 }
  0x5b   :  { %s1955_s25 = scalar_lea.hbm %s2651_s11, 16 }
  0x5c   :  { %p1956_p12 = scmp.ne.s32.totalorder %s2651_s11, %s1955_s25  ;;  %p1959_p13 = scmp.lt.u32.totalorder %s1955_s25, %s2651_s11 }
  0x5e   :  { %p1961_p0 = pnand %p1959_p13, %p1956_p12 }
  0x60   :  { %1964 = shalt.err (!%p1961_p0)
}
  0x61   :  { %s1965_s9 = scalar_lea.vmem %s153_s22, 16  ;;  %s1969_s19 = scalar_lea.vmem %s153_s22, 32 }
  0x62   :  { %p1966_p1 = scmp.ne.s32.totalorder %s153_s22, %s1965_s9  ;;  %p1970_p2 = scmp.lt.s32.totalorder %s153_s22, %s153_s22 }
  0x63   :  { %p1971_p3 = scmp.lt.s32.totalorder %s1969_s19, %s1965_s9 }
  0x65   :  { %p1972_p4 = por %p1971_p3, %p1970_p2 }
  0x67   :  { %p1973_p5 = pnand %p1972_p4, %p1966_p1 }
  0x69   :  { %1976 = shalt.err (!%p1973_p5)
}
  0x6a   :  { %155 = dma.hbm_to_vmem [thread:$0]  %s2651_s11, 16, %s153_s22, [#allocation21]  }
  0x6b   :  { %s1977_s17 = scalar_lea.hbm %s2640_s0, 256 }
  0x6c   :  { %p1978_p6 = scmp.ne.s32.totalorder %s2640_s0, %s1977_s17  ;;  %p1981_p7 = scmp.lt.u32.totalorder %s1977_s17, %s2640_s0 }
  0x6e   :  { %p1983_p8 = pnand %p1981_p7, %p1978_p6 }
  0x70   :  { %1986 = shalt.err (!%p1983_p8)
}
  0x71   :  { %s1987_s24 = scalar_lea.vmem %s32_s27, 256  ;;  %p1992_p10 = scmp.lt.s32.totalorder %s32_s27, %s32_s27 }
  0x72   :  { %p1988_p9 = scmp.ne.s32.totalorder %s32_s27, %s1987_s24  ;;  %p1993_p11 = scmp.lt.s32.totalorder %s1987_s24, %s1987_s24 }
  0x74   :  { %p1994_p12 = por %p1993_p11, %p1992_p10 }
  0x76   :  { %p1995_p13 = pnand %p1994_p12, %p1988_p9 }
  0x78   :  { %1998 = shalt.err (!%p1995_p13)
}
  0x79   :  { %s2178_s11 = smov 128   ;;  %s2179_s22 = smov 8  }
  0x7a   :  { %37 = dma.hbm_to_vmem [thread:$0]  %s2640_s0, 256, %s32_s27, [#allocation3], %s2178_s11, %s2178_s11, %s2179_s22  }
  0x7b   :  { %s2180_s25 = smov [#allocation7]   ;;  %s2181_s30 = smov [#allocation10]  }
  0x7c   :  { %s56_s29 = sshll.u32 %s2180_s25, 4  ;;  %s78_s14 = sshll.u32 %s2181_s30, 4  ;;  %s57_s29 = int_to_ptr.vmem [resolvable:$true] %s56_s29  ;;  %s79_s14 = int_to_ptr.vmem [resolvable:$true] %s78_s14 }
  0x7d   :  { %s1999_s19 = scalar_lea.hbm %s2642_s2, 16 }
  0x7e   :  { %p2000_p0 = scmp.ne.s32.totalorder %s2642_s2, %s1999_s19  ;;  %p2003_p1 = scmp.lt.u32.totalorder %s1999_s19, %s2642_s2 }
  0x80   :  { %p2005_p2 = pnand %p2003_p1, %p2000_p0 }
  0x82   :  { %2008 = shalt.err (!%p2005_p2)
}
  0x83   :  { %s2009_s0 = scalar_lea.vmem %s57_s29, 16  ;;  %s2013_s27 = scalar_lea.vmem %s57_s29, 32 }
  0x84   :  { %p2010_p3 = scmp.ne.s32.totalorder %s57_s29, %s2009_s0  ;;  %p2014_p4 = scmp.lt.s32.totalorder %s57_s29, %s57_s29 }
  0x85   :  { %p2015_p5 = scmp.lt.s32.totalorder %s2013_s27, %s2009_s0 }
  0x87   :  { %p2016_p6 = por %p2015_p5, %p2014_p4 }
  0x89   :  { %p2017_p7 = pnand %p2016_p6, %p2010_p3 }
  0x8b   :  { %2020 = shalt.err (!%p2017_p7)
}
  0x8c   :  { %59 = dma.hbm_to_vmem [thread:$0]  %s2642_s2, 16, %s57_s29, [#allocation6]  }
  0x8d   :  { %s2021_s21 = scalar_lea.hbm %s2644_s4, 16 }
  0x8e   :  { %p2022_p8 = scmp.ne.s32.totalorder %s2644_s4, %s2021_s21  ;;  %p2025_p9 = scmp.lt.u32.totalorder %s2021_s21, %s2644_s4 }
  0x90   :  { %p2027_p10 = pnand %p2025_p9, %p2022_p8 }
  0x92   :  { %2030 = shalt.err (!%p2027_p10)
}
  0x93   :  { %s2031_s30 = scalar_lea.vmem %s79_s14, 16  ;;  %s2035_s3 = scalar_lea.vmem %s79_s14, 32 }
  0x94   :  { %p2032_p11 = scmp.ne.s32.totalorder %s79_s14, %s2031_s30  ;;  %p2036_p12 = scmp.lt.s32.totalorder %s79_s14, %s79_s14 }
  0x95   :  { %p2037_p13 = scmp.lt.s32.totalorder %s2035_s3, %s2031_s30 }
  0x97   :  { %p2038_p0 = por %p2037_p13, %p2036_p12 }
  0x99   :  { %p2039_p1 = pnand %p2038_p0, %p2032_p11 }
  0x9b   :  { %2042 = shalt.err (!%p2039_p1)
}
  0x9c   :  { %81 = dma.hbm_to_vmem [thread:$0]  %s2644_s4, 16, %s79_s14, [#allocation9]  }
  0x9d   :  { %s2182_s9 = smov [#allocation13]   ;;  %s2183_s26 = smov [#allocation16]  }
  0x9e   :  { %s98_s19 = sshll.u32 %s2182_s9, 4  ;;  %s120_s23 = sshll.u32 %s2183_s26, 4  ;;  %s99_s19 = int_to_ptr.vmem [resolvable:$true] %s98_s19  ;;  %s121_s23 = int_to_ptr.vmem [resolvable:$true] %s120_s23 }
  0x9f   :  { %s2043_s0 = scalar_lea.hbm %s2646_s6, 16 }
  0xa0   :  { %p2044_p2 = scmp.ne.s32.totalorder %s2646_s6, %s2043_s0  ;;  %p2047_p3 = scmp.lt.u32.totalorder %s2043_s0, %s2646_s6 }
  0xa2   :  { %p2049_p4 = pnand %p2047_p3, %p2044_p2 }
  0xa4   :  { %2052 = shalt.err (!%p2049_p4)
}
  0xa5   :  { %s2053_s4 = scalar_lea.vmem %s99_s19, 16  ;;  %s2057_s14 = scalar_lea.vmem %s99_s19, 32 }
  0xa6   :  { %p2054_p5 = scmp.ne.s32.totalorder %s99_s19, %s2053_s4  ;;  %p2058_p6 = scmp.lt.s32.totalorder %s99_s19, %s99_s19 }
  0xa7   :  { %p2059_p7 = scmp.lt.s32.totalorder %s2057_s14, %s2053_s4 }
  0xa9   :  { %p2060_p8 = por %p2059_p7, %p2058_p6 }
  0xab   :  { %p2061_p9 = pnand %p2060_p8, %p2054_p5 }
  0xad   :  { %2064 = shalt.err (!%p2061_p9)
}
  0xae   :  { %101 = dma.hbm_to_vmem [thread:$0]  %s2646_s6, 16, %s99_s19, [#allocation12]  }
  0xaf   :  { %s2065_s5 = scalar_lea.hbm %s2648_s8, 16 }
  0xb0   :  { %p2066_p10 = scmp.ne.s32.totalorder %s2648_s8, %s2065_s5  ;;  %p2069_p11 = scmp.lt.u32.totalorder %s2065_s5, %s2648_s8 }
  0xb2   :  { %p2071_p12 = pnand %p2069_p11, %p2066_p10 }
  0xb4   :  { %2074 = shalt.err (!%p2071_p12)
}
  0xb5   :  { %s2075_s29 = scalar_lea.vmem %s121_s23, 16  ;;  %s2079_s9 = scalar_lea.vmem %s121_s23, 32 }
  0xb6   :  { %p2076_p13 = scmp.ne.s32.totalorder %s121_s23, %s2075_s29  ;;  %p2080_p0 = scmp.lt.s32.totalorder %s121_s23, %s121_s23 }
  0xb7   :  { %p2081_p1 = scmp.lt.s32.totalorder %s2079_s9, %s2075_s29 }
  0xb9   :  { %p2082_p2 = por %p2081_p1, %p2080_p0 }
  0xbb   :  { %p2083_p3 = pnand %p2082_p2, %p2076_p13 }
  0xbd   :  { %2086 = shalt.err (!%p2083_p3)
}
  0xbe   :  { %123 = dma.hbm_to_vmem [thread:$0]  %s2648_s8, 16, %s121_s23, [#allocation15]  }
  0xbf   :  { %s2184_s26 = smov [#allocation19]   ;;  %s2185_s1 = smov [#allocation22]  }
  0xc0   :  { %s142_s15 = sshll.u32 %s2184_s26, 4  ;;  %s162_s0 = sshll.u32 %s2185_s1, 4  ;;  %s143_s15 = int_to_ptr.vmem [resolvable:$true] %s142_s15  ;;  %s163_s0 = int_to_ptr.vmem [resolvable:$true] %s162_s0 }
  0xc1   :  { %s2087_s20 = scalar_lea.hbm %s2650_s10, 16 }
  0xc2   :  { %p2088_p4 = scmp.ne.s32.totalorder %s2650_s10, %s2087_s20  ;;  %p2091_p5 = scmp.lt.u32.totalorder %s2087_s20, %s2650_s10 }
  0xc4   :  { %p2093_p6 = pnand %p2091_p5, %p2088_p4 }
  0xc6   :  { %2096 = shalt.err (!%p2093_p6)
}
  0xc7   :  { %s2097_s8 = scalar_lea.vmem %s143_s15, 16  ;;  %s2101_s23 = scalar_lea.vmem %s143_s15, 32 }
  0xc8   :  { %p2098_p7 = scmp.ne.s32.totalorder %s143_s15, %s2097_s8  ;;  %p2102_p8 = scmp.lt.s32.totalorder %s143_s15, %s143_s15 }
  0xc9   :  { %p2103_p9 = scmp.lt.s32.totalorder %s2101_s23, %s2097_s8 }
  0xcb   :  { %p2104_p10 = por %p2103_p9, %p2102_p8 }
  0xcd   :  { %p2105_p11 = pnand %p2104_p10, %p2098_p7 }
  0xcf   :  { %2108 = shalt.err (!%p2105_p11)
}
  0xd0   :  { %145 = dma.hbm_to_vmem [thread:$0]  %s2650_s10, 16, %s143_s15, [#allocation18]  }
  0xd1   :  { %s2109_s25 = scalar_lea.hbm %s2652_s12, 16 }
  0xd2   :  { %p2110_p12 = scmp.ne.s32.totalorder %s2652_s12, %s2109_s25  ;;  %p2113_p13 = scmp.lt.u32.totalorder %s2109_s25, %s2652_s12 }
  0xd4   :  { %p2115_p0 = pnand %p2113_p13, %p2110_p12 }
  0xd6   :  { %2118 = shalt.err (!%p2115_p0)
}
  0xd7   :  { %s2119_s9 = scalar_lea.vmem %s163_s0, 16  ;;  %s2123_s6 = scalar_lea.vmem %s163_s0, 32 }
  0xd8   :  { %p2120_p1 = scmp.ne.s32.totalorder %s163_s0, %s2119_s9  ;;  %p2124_p2 = scmp.lt.s32.totalorder %s163_s0, %s163_s0 }
  0xd9   :  { %p2125_p3 = scmp.lt.s32.totalorder %s2123_s6, %s2119_s9 }
  0xdb   :  { %p2126_p4 = por %p2125_p3, %p2124_p2 }
  0xdd   :  { %p2127_p5 = pnand %p2126_p4, %p2120_p1 }
  0xdf   :  { %2130 = shalt.err (!%p2127_p5)
}
  0xe0   :  { %165 = dma.hbm_to_vmem [thread:$0]  %s2652_s12, 16, %s163_s0, [#allocation21]  }
  0xe1   :  { %2153 = dma.done.wait [#allocation3], 256  }
  0xe2   :  { %2154 = vsyncadd [#allocation3], 4294967040 }
  0xe3   :  { %2155 = dma.done.wait [#allocation6], 272  }
  0xe4   :  { %2156 = vsyncadd [#allocation6], 4294967024 }
  0xe5   :  { %2157 = dma.done.wait [#allocation9], 272  }
  0xe6   :  { %2158 = vsyncadd [#allocation9], 4294967024 }
  0xe7   :  { %2159 = dma.done.wait [#allocation12], 32  }
  0xe8   :  { %2160 = vsyncadd [#allocation12], 4294967264 }
  0xe9   :  { %2161 = dma.done.wait [#allocation15], 272  }
  0xea   :  { %2162 = vsyncadd [#allocation15], 4294967024 }
  0xeb   :  { %2163 = dma.done.wait [#allocation18], 528  }
  0xec   :  { %2164 = vsyncadd [#allocation18], 4294966768 }
  0xed   :  { %2165 = dma.done.wait [#allocation21], 32  }
  0xee   :  { %2166 = vsyncadd [#allocation21], 4294967264  ;;  %v2186_v0 = vmov 0.0   ;;  %vm2187_vm0 = vmmov 0   ;;  %v1795_v1 = vld [vmem:[#allocation5] sm:$0xff]   ;;  %v1796_v2 = vld [vmem:[#allocation5 + $0x8] sm:$0xff]  }
  0xef   :  { %1616 = vmatprep.subr.bf16.mxu0 %v2186_v0  ;;  %1620 = vmatprep.mubr.msk.bf16.mxu0 %vm2187_vm0, %v2186_v0  ;;  %v2448_v3 = vld [vmem:[#allocation2] sm:$0xff]  ;;  %v2450_v4 = vld [vmem:[#allocation2 + $0x8] sm:$0xff]  ;;  %vm232_vm1 = vcmask 261120   ;;  %s2188_s12 = smov 96   ;;  %vm282_vm2 = vcmask 64512   ;;  %s2189_s26 = smov 88  }
  0xf0   :  { %1624 = vmatprep.subr.bf16.mxu1 %v2186_v0  ;;  %1626 = vmatprep.mubr.msk.bf16.mxu1 %vm2187_vm0, %v2186_v0  ;;  %v208_v5 = vpack.c.bf16 %v2450_v4, %v2448_v3  ;;  %v1532_v6 = vld [vmem:[#allocation7] ss:$0 sm:$0xff]  ;;  %vm407_vm3 = vcmask 1043456   ;;  %s2191_s15 = smov 56   ;;  %s2192_s1 = smov 80   ;;  %vm1185_vm4 = vcmask 130048  }
  0xf1   :  { %1617 = vmatpush3.bf16.msra.mxu0 %v1795_v1  ;;  %s2193_s0 = smov 112   ;;  %s2194_s27 = smov 48   ;;  %vm1188_vm5 = vcmask 195584   ;;  %vm1416_vm6 = vcmask 523264  }
  0xf2   :  { %1618 = vmatprep.subr.bf16.mxu0 %v2186_v0  ;;  %s2195_s17 = smov 72   ;;  %s2196_s20 = smov 104  }
  0xf3   :  { %s2197_s7 = smov 40   ;;  %s2198_s4 = smov 16  }
  0xf4   :  { %s2199_s14 = smov 24   ;;  %s2200_s16 = smov [#allocation23]  }
  0xf5   :  { %1619 = vmatpush3.bf16.msra.mxu0 %v1796_v2  ;;  %s1514_s8 = sshll.u32 %s2200_s16, 4  ;;  %s1515_s8 = int_to_ptr.vmem [resolvable:$true] %s1514_s8 }
  0xf6   :  { %1630 = vmatprep.subr.bf16.mxu0 %v2186_v0  ;;  %s2131_s23 = scalar_lea.vmem %s1515_s8, 256  ;;  %p2136_p7 = scmp.lt.s32.totalorder %s1515_s8, %s1515_s8 }
  0xf7   :  { %p2132_p6 = scmp.ne.s32.totalorder %s1515_s8, %s2131_s23  ;;  %p2137_p8 = scmp.lt.s32.totalorder %s2131_s23, %s2131_s23 }
  0xf8   :  { %1621 = vmatmul.mubr.msk.bf16.vlgmr.msra.gmra.mrb[0].mxu0 %vm232_vm1, %v208_v5 }
  0xf9   :  { %1632 = vmatprep.mubr.msk.bf16.mxu0 %vm2187_vm0, %v2186_v0  ;;  %p2138_p9 = por %p2137_p8, %p2136_p7 }
  0xfb   :  { %p2139_p10 = pnand %p2138_p9, %p2132_p6 }
 0x1cb   :  { %v270_v7 = vpop.f32.mrb[0].mxu0 }
 0x1cc   :  { %v271_v8 = vadd.f32 %v1532_v6, %v270_v7  ;;  %v1622_v9 = vpop.f32.mrb[1].mxu0 }
 0x1cd   :  { %v273_v10 = vpop.f32.mrb[2].mxu0 }
 0x1ce   :  { %v2459_v11 = vpack.c.bf16 %v271_v8, %v271_v8  ;;  %v274_v12 = vadd.f32 %v1532_v6, %v273_v10  ;;  %v1623_v13 = vpop.f32.mrb[3].mxu0 }
 0x1d0   :  { %280 = vrot.lane.b32.xlu0 %v2459_v11, %s2188_s12  ;;  %v2462_v14 = vpack.c.bf16 %v274_v12, %v274_v12 }
 0x1d4   :  { %330 = vrot.lane.b32.xlu0 %v2462_v14, %s2188_s12 }
 0x242   :  { %v281_v15 = vpop.permute.xlu0 %280 }
 0x243   :  { %v287_v16 = vsel %vm282_vm2, %v281_v15, 0 }
 0x244   :  { %1625 = vmatpush3.bf16.xpose.msra.mxu1 %v287_v16 }
 0x245   :  { %1636 = vmatprep.subr.bf16.mxu1 %v2186_v0 }
 0x246   :  { %v331_v17 = vpop.permute.xlu0 %330 }
 0x247   :  { %v336_v18 = vsel %vm282_vm2, %v331_v17, 0 }
 0x248   :  { %1631 = vmatpush3.bf16.xpose.msra.mxu0 %v336_v18 }
 0x249   :  { %1642 = vmatprep.subr.bf16.mxu0 %v2186_v0 }
 0x24b   :  { %1627 = vmatmul.mubr.msk.bf16.vlgmr.msra.gmra.mrb[0].mxu1 %vm282_vm2, %v2459_v11 }
 0x24c   :  { %1638 = vmatprep.mubr.msk.bf16.mxu1 %vm2187_vm0, %v2186_v0 }
 0x24f   :  { %1633 = vmatmul.mubr.msk.bf16.vlgmr.msra.gmra.mrb[4].mxu0 %vm282_vm2, %v2462_v14 }
 0x250   :  { %1644 = vmatprep.mubr.msk.bf16.mxu0 %vm2187_vm0, %v2186_v0 }
 0x31e   :  { %v323_v19 = vpop.f32.mrb[0].mxu1 }
 0x31f   :  { %v1628_v20 = vpop.f32.mrb[1].mxu1  ;;  %v378_v21 = vsel %vm282_vm2, %v323_v19, -inf }
 0x320   :  { %379 = vmax.xlane.f32.xlu1 %v378_v21  ;;  %v326_v22 = vpop.f32.mrb[2].mxu1 }
 0x321   :  { %v1629_v23 = vpop.f32.mrb[3].mxu1 }
 0x322   :  { %v372_v24 = vpop.f32.mrb[4].mxu0 }
 0x323   :  { %v1634_v25 = vpop.f32.mrb[5].mxu0  ;;  %v381_v26 = vsel %vm282_vm2, %v372_v24, -inf }
 0x324   :  { %382 = vmax.xlane.f32.xlu1 %v381_v26  ;;  %v375_v27 = vpop.f32.mrb[6].mxu0 }
 0x325   :  { %v1635_v28 = vpop.f32.mrb[7].mxu0 }
 0x335   :  { %402 = vrot.lane.b32.xlu1 %v2459_v11, %s2170_s18 }
 0x339   :  { %451 = vrot.lane.b32.xlu1 %v2462_v14, %s2170_s18  ;;  %s2190_s18 = smov 120  }
 0x33d   :  { %501 = vrot.lane.b32.xlu1 %v2459_v11, %s2189_s26 }
 0x3ad   :  { %v380_v29 = vpop.xlane.xlu1 %379 }
 0x3ae   :  { %v384_v30 = vsub.f32 %v323_v19, %v380_v29 }
 0x3b0   :  { %v386_v31 = vmul.f32 1.442695, %v384_v30 }
 0x3b1   :  { %v383_v32 = vpop.xlane.xlu1 %382 }
 0x3b2   :  { %1805 = vpow2.f32 %v386_v31  ;;  %v385_v33 = vsub.f32 %v372_v24, %v383_v32 }
 0x3b4   :  { %v388_v34 = vmul.f32 1.442695, %v385_v33 }
 0x3b5   :  { %v403_v35 = vpop.permute.xlu1 %402 }
 0x3b6   :  { %1807 = vpow2.f32 %v388_v34  ;;  %v409_v36 = vsel %vm407_vm3, %v403_v35, 0 }
 0x3b7   :  { %1637 = vmatpush3.bf16.msra.mxu1 %v409_v36 }
 0x3b8   :  { %1648 = vmatprep.subr.bf16.mxu1 %v2186_v0 }
 0x3b9   :  { %v452_v37 = vpop.permute.xlu1 %451 }
 0x3ba   :  { %v457_v38 = vsel %vm407_vm3, %v452_v37, 0 }
 0x3bb   :  { %1643 = vmatpush3.bf16.msra.mxu0 %v457_v38 }
 0x3bc   :  { %v1806_v39 = vpop.eup %1805  ;;  %1654 = vmatprep.subr.bf16.mxu0 %v2186_v0 }
 0x3bd   :  { %v390_v40 = vsel %vm282_vm2, %v1806_v39, 0.0  ;;  %v502_v43 = vpop.permute.xlu1 %501 }
 0x3be   :  { %391 = vadd.xlane.f32.xlu0 %v390_v40  ;;  %v507_v50 = vsel %vm282_vm2, %v502_v43, 0 }
 0x3c0   :  { %v1808_v41 = vpop.eup %1807 }
 0x3c1   :  { %v393_v42 = vsel %vm282_vm2, %v1808_v41, 0.0 }
 0x3c2   :  { %394 = vadd.xlane.f32.xlu1 %v393_v42 }
 0x3d3   :  { %551 = vrot.lane.b32.xlu1 %v2462_v14, %s2189_s26 }
 0x3d4   :  { %499 = vrot.lane.b32.xlu0 %v2459_v11, %s2190_s18 }
 0x3d7   :  { %549 = vrot.lane.b32.xlu1 %v2462_v14, %s2190_s18 }
 0x44b   :  { %v392_v44 = vpop.xlane.xlu0 %391 }
 0x44c   :  { %1809 = vrcp.f32 %v392_v44 }
 0x44f   :  { %v395_v45 = vpop.xlane.xlu1 %394  ;;  %v500_v55 = vpop.permute.xlu0 %499 }
 0x450   :  { %1811 = vrcp.f32 %v395_v45 }
 0x453   :  { %v552_v52 = vpop.permute.xlu1 %551 }
 0x454   :  { %v557_v54 = vsel %vm282_vm2, %v552_v52, 0 }
 0x456   :  { %v1810_v46 = vpop.eup %1809 }
 0x457   :  { %v397_v47 = vmul.f32 %v1810_v46, %v1806_v39  ;;  %v550_v56 = vpop.permute.xlu1 %549 }
 0x459   :  { %v400_v48 = vpack.c.bf16 %v397_v47, %v397_v47 }
 0x45a   :  { %v1812_v49 = vpop.eup %1811 }
 0x45b   :  { %v399_v51 = vmul.f32 %v1812_v49, %v1808_v41  ;;  %1639 = vmatmul.mubr.msk.bf16.vlgmr.msra.gmra.mrb[4].mxu1 %vm282_vm2, %v400_v48 }
 0x45c   :  { %1649 = vmatpush3.bf16.xpose.msra.mxu1 %v507_v50  ;;  %1650 = vmatprep.mubr.msk.bf16.mxu1 %vm2187_vm0, %v2186_v0 }
 0x45d   :  { %v401_v53 = vpack.c.bf16 %v399_v51, %v399_v51  ;;  %1660 = vmatprep.subr.bf16.mxu1 %v2186_v0 }
 0x45f   :  { %1645 = vmatmul.mubr.msk.bf16.vlgmr.msra.gmra.mrb[8].mxu0 %vm282_vm2, %v401_v53 }
 0x460   :  { %1655 = vmatpush3.bf16.xpose.msra.mxu0 %v557_v54  ;;  %1656 = vmatprep.mubr.msk.bf16.mxu0 %vm2187_vm0, %v2186_v0 }
 0x461   :  { %1666 = vmatprep.subr.bf16.mxu0 %v2186_v0 }
 0x463   :  { %1651 = vmatmul.mubr.msk.bf16.vlgmr.msra.gmra.mrb[8].mxu1 %vm282_vm2, %v500_v55 }
 0x464   :  { %1662 = vmatprep.mubr.msk.bf16.mxu1 %vm2187_vm0, %v2186_v0 }
 0x467   :  { %1657 = vmatmul.mubr.msk.bf16.vlgmr.msra.gmra.mrb[12].mxu0 %vm282_vm2, %v550_v56 }
 0x468   :  { %1668 = vmatprep.mubr.msk.bf16.mxu0 %vm2187_vm0, %v2186_v0 }
 0x52e   :  { %v2509_v57 = vpop.f32.mrb[4].mxu1 }
 0x52f   :  { %v1640_v58 = vpop.f32.mrb[5].mxu1 }
 0x530   :  { %v448_v59 = vpop.f32.mrb[6].mxu1 }
 0x531   :  { %v1641_v60 = vpop.f32.mrb[7].mxu1 }
 0x532   :  { %v2511_v61 = vpop.f32.mrb[8].mxu0 }
 0x533   :  { %v1646_v62 = vpop.f32.mrb[9].mxu0 }
 0x534   :  { %v496_v63 = vpop.f32.mrb[10].mxu0 }
 0x535   :  { %v1647_v1 = vpop.f32.mrb[11].mxu0 }
 0x536   :  { %v543_v2 = vpop.f32.mrb[8].mxu1 }
 0x537   :  { %v1652_v5 = vpop.f32.mrb[9].mxu1  ;;  %v599_v6 = vsel %vm282_vm2, %v543_v2, -inf }
 0x538   :  { %600 = vmax.xlane.f32.xlu1 %v599_v6  ;;  %v546_v7 = vpop.f32.mrb[10].mxu1 }
 0x539   :  { %v1653_v8 = vpop.f32.mrb[11].mxu1 }
 0x53a   :  { %v593_v9 = vpop.f32.mrb[12].mxu0 }
 0x53b   :  { %v1658_v10 = vpop.f32.mrb[13].mxu0  ;;  %v602_v12 = vsel %vm282_vm2, %v593_v9, -inf }
 0x53c   :  { %603 = vmax.xlane.f32.xlu0 %v602_v12  ;;  %v596_v13 = vpop.f32.mrb[14].mxu0 }
 0x53d   :  { %v1659_v15 = vpop.f32.mrb[15].mxu0 }
 0x549   :  { %623 = vrot.lane.b32.xlu1 %v2459_v11, %s2191_s15 }
 0x54d   :  { %721 = vrot.lane.b32.xlu1 %v2459_v11, %s2192_s1 }
 0x552   :  { %671 = vrot.lane.b32.xlu0 %v2462_v14, %s2191_s15 }
 0x556   :  { %719 = vrot.lane.b32.xlu0 %v2459_v11, %s2193_s0 }
 0x5c5   :  { %v601_v16 = vpop.xlane.xlu1 %600 }
 0x5c6   :  { %v605_v17 = vsub.f32 %v543_v2, %v601_v16 }
 0x5c8   :  { %v607_v18 = vmul.f32 1.442695, %v605_v17 }
 0x5c9   :  { %v624_v19 = vpop.permute.xlu1 %623  ;;  %v604_v20 = vpop.xlane.xlu0 %603 }
 0x5ca   :  { %1813 = vpow2.f32 %v607_v18  ;;  %v629_v21 = vsel %vm407_vm3, %v624_v19, 0  ;;  %v606_v22 = vsub.f32 %v593_v9, %v604_v20 }
 0x5cb   :  { %1661 = vmatpush3.bf16.msra.mxu1 %v629_v21 }
 0x5cc   :  { %v609_v23 = vmul.f32 1.442695, %v606_v22  ;;  %1672 = vmatprep.subr.bf16.mxu1 %v2186_v0 }
 0x5cd   :  { %v672_v24 = vpop.permute.xlu0 %671  ;;  %v722_v30 = vpop.permute.xlu1 %721 }
 0x5ce   :  { %1815 = vpow2.f32 %v609_v23  ;;  %v677_v25 = vsel %vm407_vm3, %v672_v24, 0  ;;  %v727_v37 = vsel %vm282_vm2, %v722_v30, 0 }
 0x5cf   :  { %1667 = vmatpush3.bf16.msra.mxu0 %v677_v25 }
 0x5d0   :  { %1678 = vmatprep.subr.bf16.mxu0 %v2186_v0 }
 0x5d1   :  { %v720_v42 = vpop.permute.xlu0 %719 }
 0x5d4   :  { %v1814_v26 = vpop.eup %1813 }
 0x5d5   :  { %v611_v27 = vsel %vm282_vm2, %v1814_v26, 0.0 }
 0x5d6   :  { %612 = vadd.xlane.f32.xlu1 %v611_v27 }
 0x5d8   :  { %v1816_v28 = vpop.eup %1815 }
 0x5d9   :  { %v614_v29 = vsel %vm282_vm2, %v1816_v28, 0.0 }
 0x5da   :  { %615 = vadd.xlane.f32.xlu1 %v614_v29 }
 0x5eb   :  { %771 = vrot.lane.b32.xlu1 %v2462_v14, %s2192_s1 }
 0x5ef   :  { %769 = vrot.lane.b32.xlu1 %v2462_v14, %s2193_s0 }
 0x663   :  { %v613_v31 = vpop.xlane.xlu1 %612 }
 0x664   :  { %1817 = vrcp.f32 %v613_v31 }
 0x667   :  { %v616_v32 = vpop.xlane.xlu1 %615 }
 0x668   :  { %1819 = vrcp.f32 %v616_v32 }
 0x66b   :  { %v772_v39 = vpop.permute.xlu1 %771 }
 0x66c   :  { %v777_v41 = vsel %vm282_vm2, %v772_v39, 0 }
 0x66e   :  { %v1818_v33 = vpop.eup %1817 }
 0x66f   :  { %v618_v34 = vmul.f32 %v1818_v33, %v1814_v26  ;;  %v770_v43 = vpop.permute.xlu1 %769 }
 0x671   :  { %v621_v35 = vpack.c.bf16 %v618_v34, %v618_v34 }
 0x672   :  { %v1820_v36 = vpop.eup %1819 }
 0x673   :  { %v620_v38 = vmul.f32 %v1820_v36, %v1816_v28  ;;  %1663 = vmatmul.mubr.msk.bf16.vlgmr.msra.gmra.mrb[12].mxu1 %vm282_vm2, %v621_v35 }
 0x674   :  { %1673 = vmatpush3.bf16.xpose.msra.mxu1 %v727_v37  ;;  %1674 = vmatprep.mubr.msk.bf16.mxu1 %vm2187_vm0, %v2186_v0 }
 0x675   :  { %v622_v40 = vpack.c.bf16 %v620_v38, %v620_v38  ;;  %1684 = vmatprep.subr.bf16.mxu1 %v2186_v0 }
 0x677   :  { %1669 = vmatmul.mubr.msk.bf16.vlgmr.msra.gmra.mrb[16].mxu0 %vm282_vm2, %v622_v40 }
 0x678   :  { %1679 = vmatpush3.bf16.xpose.msra.mxu0 %v777_v41  ;;  %1680 = vmatprep.mubr.msk.bf16.mxu0 %vm2187_vm0, %v2186_v0 }
 0x679   :  { %1690 = vmatprep.subr.bf16.mxu0 %v2186_v0 }
 0x67b   :  { %1675 = vmatmul.mubr.msk.bf16.vlgmr.msra.gmra.mrb[16].mxu1 %vm282_vm2, %v720_v42 }
 0x67c   :  { %1686 = vmatprep.mubr.msk.bf16.mxu1 %vm2187_vm0, %v2186_v0 }
 0x67f   :  { %1681 = vmatmul.mubr.msk.bf16.vlgmr.msra.gmra.mrb[20].mxu0 %vm282_vm2, %v770_v43 }
 0x680   :  { %1692 = vmatprep.mubr.msk.bf16.mxu0 %vm2187_vm0, %v2186_v0 }
 0x746   :  { %v2543_v44 = vpop.f32.mrb[12].mxu1 }
 0x747   :  { %v1664_v45 = vpop.f32.mrb[13].mxu1 }
 0x748   :  { %v668_v46 = vpop.f32.mrb[14].mxu1 }
 0x749   :  { %v1665_v47 = vpop.f32.mrb[15].mxu1 }
 0x74a   :  { %v2545_v48 = vpop.f32.mrb[16].mxu0 }
 0x74b   :  { %v1780_v49 = vpack.i.bf16 %v2545_v48, %v2543_v44  ;;  %v1670_v50 = vpop.f32.mrb[17].mxu0 }
 0x74c   :  { %v716_v51 = vpop.f32.mrb[18].mxu0 }
 0x74d   :  { %v1671_v52 = vpop.f32.mrb[19].mxu0 }
 0x74e   :  { %v763_v53 = vpop.f32.mrb[16].mxu1 }
 0x74f   :  { %v1676_v54 = vpop.f32.mrb[17].mxu1  ;;  %v819_v55 = vsel %vm282_vm2, %v763_v53, -inf }
 0x750   :  { %820 = vmax.xlane.f32.xlu0 %v819_v55  ;;  %v766_v56 = vpop.f32.mrb[18].mxu1 }
 0x751   :  { %v1677_v58 = vpop.f32.mrb[19].mxu1 }
 0x752   :  { %v813_v59 = vpop.f32.mrb[20].mxu0 }
 0x753   :  { %v1682_v60 = vpop.f32.mrb[21].mxu0  ;;  %v822_v62 = vsel %vm282_vm2, %v813_v59, -inf }
 0x754   :  { %823 = vmax.xlane.f32.xlu1 %v822_v62  ;;  %v816_v63 = vpop.f32.mrb[22].mxu0 }
 0x755   :  { %v1683_v1 = vpop.f32.mrb[23].mxu0 }
 0x765   :  { %843 = vrot.lane.b32.xlu1 %v2459_v11, %s2194_s27 }
 0x769   :  { %941 = vrot.lane.b32.xlu1 %v2459_v11, %s2195_s17 }
 0x76d   :  { %991 = vrot.lane.b32.xlu1 %v2462_v14, %s2195_s17 }
 0x771   :  { %989 = vrot.lane.b32.xlu1 %v2462_v14, %s2196_s20 }
 0x7dd   :  { %v821_v2 = vpop.xlane.xlu0 %820 }
 0x7de   :  { %v825_v5 = vsub.f32 %v763_v53, %v821_v2 }
 0x7e0   :  { %v827_v6 = vmul.f32 1.442695, %v825_v5 }
 0x7e1   :  { %v824_v7 = vpop.xlane.xlu1 %823 }
 0x7e2   :  { %1821 = vpow2.f32 %v827_v6  ;;  %v826_v8 = vsub.f32 %v813_v59, %v824_v7 }
 0x7e4   :  { %v829_v9 = vmul.f32 1.442695, %v826_v8 }
 0x7e5   :  { %v844_v10 = vpop.permute.xlu1 %843 }
 0x7e6   :  { %1823 = vpow2.f32 %v829_v9  ;;  %v849_v12 = vsel %vm407_vm3, %v844_v10, 0 }
 0x7e7   :  { %1685 = vmatpush3.bf16.msra.mxu1 %v849_v12 }
 0x7e8   :  { %1696 = vmatprep.subr.bf16.mxu1 %v2186_v0 }
 0x7e9   :  { %v942_v23 = vpop.permute.xlu1 %941 }
 0x7ea   :  { %v947_v27 = vsel %vm282_vm2, %v942_v23, 0 }
 0x7ec   :  { %v1822_v13 = vpop.eup %1821 }
 0x7ed   :  { %v831_v15 = vsel %vm282_vm2, %v1822_v13, 0.0  ;;  %v992_v29 = vpop.permute.xlu1 %991 }
 0x7ee   :  { %832 = vadd.xlane.f32.xlu0 %v831_v15  ;;  %v997_v31 = vsel %vm282_vm2, %v992_v29, 0 }
 0x7f0   :  { %v1824_v16 = vpop.eup %1823 }
 0x7f1   :  { %v834_v17 = vsel %vm282_vm2, %v1824_v16, 0.0  ;;  %v990_v33 = vpop.permute.xlu1 %989 }
 0x7f2   :  { %835 = vadd.xlane.f32.xlu0 %v834_v17  ;;  %v1798_v17 = vld [vmem:[#allocation8 + $0x8] sm:$0xff]  }
 0x808   :  { %891 = vrot.lane.b32.xlu0 %v2462_v14, %s2194_s27 }
 0x80c   :  { %939 = vrot.lane.b32.xlu0 %v2459_v11, %s2196_s20 }
 0x87b   :  { %v833_v18 = vpop.xlane.xlu0 %832 }
 0x87c   :  { %1825 = vrcp.f32 %v833_v18 }
 0x87f   :  { %v836_v19 = vpop.xlane.xlu0 %835 }
 0x880   :  { %1827 = vrcp.f32 %v836_v19 }
 0x883   :  { %v892_v20 = vpop.permute.xlu0 %891 }
 0x884   :  { %v897_v21 = vsel %vm407_vm3, %v892_v20, 0 }
 0x885   :  { %1691 = vmatpush3.bf16.msra.mxu0 %v897_v21 }
 0x886   :  { %v1826_v22 = vpop.eup %1825  ;;  %1702 = vmatprep.subr.bf16.mxu0 %v2186_v0 }
 0x887   :  { %v838_v24 = vmul.f32 %v1826_v22, %v1822_v13  ;;  %v940_v32 = vpop.permute.xlu0 %939 }
 0x889   :  { %v841_v25 = vpack.c.bf16 %v838_v24, %v838_v24 }
 0x88a   :  { %v1828_v26 = vpop.eup %1827 }
 0x88b   :  { %v840_v28 = vmul.f32 %v1828_v26, %v1824_v16  ;;  %1687 = vmatmul.mubr.msk.bf16.vlgmr.msra.gmra.mrb[20].mxu1 %vm282_vm2, %v841_v25  ;;  %v1797_v16 = vld [vmem:[#allocation8] sm:$0xff]  }
 0x88c   :  { %1697 = vmatpush3.bf16.xpose.msra.mxu1 %v947_v27  ;;  %1698 = vmatprep.mubr.msk.bf16.mxu1 %vm2187_vm0, %v2186_v0 }
 0x88d   :  { %v842_v30 = vpack.c.bf16 %v840_v28, %v840_v28  ;;  %1708 = vmatprep.subr.bf16.mxu1 %v2186_v0 }
 0x88f   :  { %1693 = vmatmul.mubr.msk.bf16.vlgmr.msra.gmra.mrb[24].mxu0 %vm282_vm2, %v842_v30 }
 0x890   :  { %1703 = vmatpush3.bf16.xpose.msra.mxu0 %v997_v31  ;;  %1704 = vmatprep.mubr.msk.bf16.mxu0 %vm2187_vm0, %v2186_v0 }
 0x891   :  { %1714 = vmatprep.subr.bf16.mxu0 %v2186_v0 }
 0x893   :  { %1699 = vmatmul.mubr.msk.bf16.vlgmr.msra.gmra.mrb[24].mxu1 %vm282_vm2, %v940_v32 }
 0x894   :  { %1710 = vmatprep.mubr.msk.bf16.mxu1 %vm2187_vm0, %v2186_v0 }
 0x897   :  { %1705 = vmatmul.mubr.msk.bf16.vlgmr.msra.gmra.mrb[28].mxu0 %vm282_vm2, %v990_v33 }
 0x898   :  { %1716 = vmatprep.mubr.msk.bf16.mxu0 %vm2187_vm0, %v2186_v0 }
 0x95e   :  { %v885_v34 = vpop.f32.mrb[20].mxu1 }
 0x95f   :  { %v1688_v35 = vpop.f32.mrb[21].mxu1 }
 0x960   :  { %v888_v36 = vpop.f32.mrb[22].mxu1 }
 0x961   :  { %v1689_v37 = vpop.f32.mrb[23].mxu1 }
 0x962   :  { %v933_v38 = vpop.f32.mrb[24].mxu0 }
 0x963   :  { %v1785_v39 = vpack.i.bf16 %v933_v38, %v885_v34  ;;  %v1694_v40 = vpop.f32.mrb[25].mxu0 }
 0x964   :  { %v936_v41 = vpop.f32.mrb[26].mxu0 }
 0x965   :  { %v1695_v42 = vpop.f32.mrb[27].mxu0 }
 0x966   :  { %v983_v43 = vpop.f32.mrb[24].mxu1 }
 0x967   :  { %v1700_v45 = vpop.f32.mrb[25].mxu1  ;;  %v1039_v46 = vsel %vm282_vm2, %v983_v43, -inf }
 0x968   :  { %1040 = vmax.xlane.f32.xlu0 %v1039_v46  ;;  %v986_v47 = vpop.f32.mrb[26].mxu1 }
 0x969   :  { %v1701_v50 = vpop.f32.mrb[27].mxu1 }
 0x96a   :  { %v1033_v51 = vpop.f32.mrb[28].mxu0 }
 0x96b   :  { %v1706_v52 = vpop.f32.mrb[29].mxu0  ;;  %v1042_v53 = vsel %vm282_vm2, %v1033_v51, -inf }
 0x96c   :  { %1043 = vmax.xlane.f32.xlu1 %v1042_v53  ;;  %v1036_v54 = vpop.f32.mrb[30].mxu0 }
 0x96d   :  { %v1707_v55 = vpop.f32.mrb[31].mxu0 }
 0x97d   :  { %1063 = vrot.lane.b32.xlu1 %v2459_v11, %s2197_s7 }
 0x981   :  { %1781 = vrot.lane.b32.xlu1 %v1780_v49, %s2179_s22 }
 0x985   :  { %1786 = vrot.lane.b32.xlu1 %v1785_v39, %s2198_s4 }
 0x9f5   :  { %v1041_v56 = vpop.xlane.xlu0 %1040 }
 0x9f6   :  { %v1045_v58 = vsub.f32 %v983_v43, %v1041_v56  ;;  %v1552_v43 = vld [vmem:[#allocation10] ss:$0 sm:$0xff] }
 0x9f8   :  { %v1047_v59 = vmul.f32 1.442695, %v1045_v58 }
 0x9f9   :  { %v1044_v60 = vpop.xlane.xlu1 %1043 }
 0x9fa   :  { %1829 = vpow2.f32 %v1047_v59  ;;  %v1046_v62 = vsub.f32 %v1033_v51, %v1044_v60 }
 0x9fc   :  { %v1049_v63 = vmul.f32 1.442695, %v1046_v62 }
 0x9fd   :  { %v1064_v1 = vpop.permute.xlu1 %1063 }
 0x9fe   :  { %1831 = vpow2.f32 %v1049_v63  ;;  %v1069_v2 = vsel %vm407_vm3, %v1064_v1, 0 }
 0x9ff   :  { %1709 = vmatpush3.bf16.msra.mxu1 %v1069_v2 }
 0xa00   :  { %1720 = vmatprep.subr.bf16.mxu1 %v2186_v0 }
 0xa01   :  { %v1782_v27 = vpop.permute.xlu1 %1781 }
 0xa02   :  { %v1784_v29 = vunpack.i.h.bf16 %v1782_v27  ;;  %v1783_v30 = vunpack.i.l.bf16 %v1782_v27 }
 0xa04   :  { %v1830_v11 = vpop.eup %1829  ;;  %v1184_v34 = vsel %vm282_vm2, %v2511_v61, %v1784_v29  ;;  %v1183_v35 = vsel %vm282_vm2, %v2509_v57, %v1783_v30 }
 0xa05   :  { %v1051_v44 = vsel %vm282_vm2, %v1830_v11, 0.0  ;;  %v1787_v28 = vpop.permute.xlu1 %1786 }
 0xa06   :  { %1052 = vadd.xlane.f32.xlu0 %v1051_v44  ;;  %v1789_v31 = vunpack.i.h.bf16 %v1787_v28  ;;  %v1788_v32 = vunpack.i.l.bf16 %v1787_v28  ;;  %v1801_v44 = vld [vmem:[#allocation17] sm:$0xff]  }
 0xa08   :  { %v1832_v48 = vpop.eup %1831  ;;  %v1186_v38 = vsel %vm1185_vm4, %v1183_v35, %v1788_v32  ;;  %v1187_v39 = vsel %vm1185_vm4, %v1184_v34, %v1789_v31  ;;  %v1562_v34 = vld [vmem:[#allocation19] ss:$0 sm:$0xff] }
 0xa09   :  { %v1054_v49 = vsel %vm282_vm2, %v1832_v48, 0.0 }
 0xa0a   :  { %1055 = vadd.xlane.f32.xlu0 %v1054_v49 }
 0xa20   :  { %1111 = vrot.lane.b32.xlu0 %v2462_v14, %s2197_s7 }
 0xa93   :  { %v1053_v5 = vpop.xlane.xlu0 %1052 }
 0xa94   :  { %1833 = vrcp.f32 %v1053_v5 }
 0xa97   :  { %v1056_v6 = vpop.xlane.xlu0 %1055 }
 0xa98   :  { %1835 = vrcp.f32 %v1056_v6 }
 0xa9b   :  { %v1112_v7 = vpop.permute.xlu0 %1111 }
 0xa9c   :  { %v1117_v8 = vsel %vm407_vm3, %v1112_v7, 0 }
 0xa9d   :  { %1715 = vmatpush3.bf16.msra.mxu0 %v1117_v8 }
 0xa9e   :  { %v1834_v9 = vpop.eup %1833  ;;  %1728 = vmatprep.subr.bf16.mxu0 %v2186_v0 }
 0xa9f   :  { %v1058_v10 = vmul.f32 %v1834_v9, %v1830_v11  ;;  %v1799_v11 = vld [vmem:[#allocation14] sm:$0xff]  }
 0xaa1   :  { %v1061_v12 = vpack.c.bf16 %v1058_v10, %v1058_v10 }
 0xaa2   :  { %v1836_v13 = vpop.eup %1835 }
 0xaa3   :  { %v1060_v15 = vmul.f32 %v1836_v13, %v1832_v48  ;;  %1711 = vmatmul.mubr.msk.bf16.vlgmr.msra.gmra.mrb[28].mxu1 %vm282_vm2, %v1061_v12  ;;  %v1802_v48 = vld [vmem:[#allocation17 + $0x8] sm:$0xff]  }
 0xaa4   :  { %1724 = vmatprep.mubr.msk.bf16.mxu1 %vm2187_vm0, %v2186_v0  ;;  %1721 = vmatpush3.bf16.msra.mxu1 %v1797_v16  ;;  %v1556_v12 = vld [vmem:[#allocation11] ss:$0 sm:$0xff] }
 0xaa5   :  { %v1062_v14 = vpack.c.bf16 %v1060_v15, %v1060_v15  ;;  %1722 = vmatprep.subr.bf16.mxu1 %v2186_v0 }
 0xaa7   :  { %1717 = vmatmul.mubr.msk.bf16.vlgmr.msra.gmra.mrb[32].mxu0 %vm282_vm2, %v1062_v14 }
 0xaa8   :  { %1732 = vmatprep.mubr.msk.bf16.mxu0 %vm2187_vm0, %v2186_v0  ;;  %1723 = vmatpush3.bf16.msra.mxu1 %v1798_v17  ;;  %v1557_v17 = vld [vmem:[#allocation13] ss:$0 sm:$0xff] }
 0xaa9   :  { %1736 = vmatprep.subr.bf16.mxu1 %v2186_v0  ;;  %1729 = vmatpush3.bf16.msra.mxu0 %v1799_v11  ;;  %v1569_v11 = vld [vmem:[#allocation22] ss:$0 sm:$0xff] }
 0xaaa   :  { %1730 = vmatprep.subr.bf16.mxu0 %v2186_v0 }
 0xb76   :  { %v1105_v18 = vpop.f32.mrb[28].mxu1 }
 0xb77   :  { %v1712_v19 = vpop.f32.mrb[29].mxu1 }
 0xb78   :  { %v1108_v20 = vpop.f32.mrb[30].mxu1 }
 0xb79   :  { %v1713_v21 = vpop.f32.mrb[31].mxu1 }
 0xb7a   :  { %v1153_v22 = vpop.f32.mrb[32].mxu0 }
 0xb7b   :  { %v1790_v23 = vpack.i.bf16 %v1153_v22, %v1105_v18  ;;  %v1718_v24 = vpop.f32.mrb[33].mxu0  ;;  %v1803_v22 = vld [vmem:[#allocation17 + $0x10] sm:$0xff]  }
 0xb7c   :  { %v1156_v25 = vpop.f32.mrb[34].mxu0  ;;  %v1558_v24 = vld [vmem:[#allocation16] ss:$0 sm:$0xff] }
 0xb7d   :  { %1791 = vrot.lane.b32.xlu0 %v1790_v23, %s2199_s14  ;;  %v1719_v26 = vpop.f32.mrb[35].mxu0  ;;  %v1804_v23 = vld [vmem:[#allocation17 + $0x18] sm:$0xff]  }
 0xbef   :  { %v1792_v33 = vpop.permute.xlu0 %1791 }
 0xbf0   :  { %v1794_v36 = vunpack.i.h.bf16 %v1792_v33  ;;  %v1793_v37 = vunpack.i.l.bf16 %v1792_v33 }
 0xbf2   :  { %v1190_v40 = vsel %vm1188_vm5, %v1187_v39, %v1794_v36  ;;  %v1189_v41 = vsel %vm1188_vm5, %v1186_v38, %v1793_v37 }
 0xbf3   :  { %v1191_v42 = vpack.c.bf16 %v1190_v40, %v1189_v41 }
 0xbf5   :  { %1725 = vmatmul.mubr.msk.bf16.vlgmr.msra.gmra.mrb[32].mxu1 %vm232_vm1, %v1191_v42 }
 0xbf6   :  { %1744 = vmatprep.mubr.msk.bf16.mxu1 %vm2187_vm0, %v2186_v0  ;;  %1737 = vmatpush3.bf16.msra.mxu1 %v1801_v44 }
 0xbf7   :  { %1738 = vmatprep.subr.bf16.mxu1 %v2186_v0 }
 0xbfa   :  { %1739 = vmatpush3.bf16.msra.mxu1 %v1802_v48 }
 0xbfb   :  { %1740 = vmatprep.subr.bf16.mxu1 %v2186_v0 }
 0xbfe   :  { %1741 = vmatpush3.bf16.msra.mxu1 %v1803_v22 }
 0xbff   :  { %1742 = vmatprep.subr.bf16.mxu1 %v2186_v0 }
 0xc02   :  { %1743 = vmatpush3.bf16.msra.mxu1 %v1804_v23 }
 0xcc8   :  { %v1252_v45 = vpop.f32.mrb[32].mxu1 }
 0xcc9   :  { %v1253_v46 = vadd.f32 %v1552_v43, %v1252_v45  ;;  %v1726_v47 = vpop.f32.mrb[33].mxu1 }
 0xcca   :  { %v1255_v61 = vpop.f32.mrb[34].mxu1 }
 0xccb   :  { %v1256_v50 = vadd.f32 %v1552_v43, %v1255_v61  ;;  %v1727_v51 = vpop.f32.mrb[35].mxu1  ;;  %v1259_v57 = vadd.f32 %v1253_v46, %v2448_v3 }
 0xccd   :  { %v1263_v52 = vsel %vm232_vm1, %v1259_v57, 0.0  ;;  %v1260_v53 = vadd.f32 %v1256_v50, %v2450_v4  ;;  %v1800_v4 = vld [vmem:[#allocation14 + $0x8] sm:$0xff]  }
 0xcce   :  { %1264 = vadd.xlane.f32.xlu1 %v1263_v52  ;;  %1731 = vmatpush3.bf16.msra.mxu0 %v1800_v4 }
 0xccf   :  { %v1266_v54 = vsel %vm232_vm1, %v1260_v53, 0.0 }
 0xcd0   :  { %1267 = vadd.xlane.f32.xlu0 %v1266_v54 }
 0xd5b   :  { %v1265_v55 = vpop.xlane.xlu1 %1264 }
 0xd5c   :  { %v1270_v56 = vmul.f32 0.03125, %v1265_v55 }
 0xd5d   :  { %v1268_v58 = vpop.xlane.xlu0 %1267 }
 0xd5e   :  { %v1272_v59 = vsub.f32 %v1259_v57, %v1270_v56  ;;  %v1271_v60 = vmul.f32 0.03125, %v1268_v58 }
 0xd60   :  { %v1273_v62 = vsub.f32 %v1260_v53, %v1271_v60  ;;  %v1274_v63 = vmul.f32 %v1272_v59, %v1272_v59 }
 0xd62   :  { %v1276_v1 = vsel %vm232_vm1, %v1274_v63, 0.0  ;;  %v1275_v2 = vmul.f32 %v1273_v62, %v1273_v62 }
 0xd63   :  { %1277 = vadd.xlane.f32.xlu0 %v1276_v1  ;;  %v1568_v1 = vld [vmem:[#allocation20] ss:$0 sm:$0xff] }
 0xd64   :  { %v1279_v3 = vsel %vm232_vm1, %v1275_v2, 0.0 }
 0xd65   :  { %1280 = vadd.xlane.f32.xlu1 %v1279_v3 }
 0xdf0   :  { %v1278_v49 = vpop.xlane.xlu0 %1277 }
 0xdf1   :  { %v1282_v5 = vmul.f32 0.03125, %v1278_v49 }
 0xdf2   :  { %v1281_v6 = vpop.xlane.xlu1 %1280 }
 0xdf3   :  { %v1284_v7 = vadd.f32 1e-05, %v1282_v5  ;;  %v1283_v8 = vmul.f32 0.03125, %v1281_v6 }
 0xdf5   :  { %1837 = vrsqrt.f32 %v1284_v7  ;;  %v1285_v9 = vadd.f32 1e-05, %v1283_v8 }
 0xdf7   :  { %1839 = vrsqrt.f32 %v1285_v9 }
 0xdff   :  { %v1838_v10 = vpop.eup %1837 }
 0xe00   :  { %v1288_v13 = vmul.f32 %v1838_v10, %v1272_v59 }
 0xe01   :  { %v1840_v15 = vpop.eup %1839 }
 0xe02   :  { %v1296_v14 = vmul.f32 %v1556_v12, %v1288_v13  ;;  %v1289_v16 = vmul.f32 %v1840_v15, %v1273_v62 }
 0xe04   :  { %v1297_v18 = vmul.f32 %v1556_v12, %v1289_v16  ;;  %v1304_v19 = vadd.f32 %v1557_v17, %v1296_v14 }
 0xe06   :  { %v1305_v20 = vadd.f32 %v1557_v17, %v1297_v18 }
 0xe08   :  { %v1306_v21 = vpack.c.bf16 %v1305_v20, %v1304_v19 }
 0xe0a   :  { %1733 = vmatmul.mubr.msk.bf16.vlgmr.msra.gmra.mrb[36].mxu0 %vm232_vm1, %v1306_v21 }
 0xedd   :  { %v1367_v25 = vpop.f32.mrb[36].mxu0 }
 0xede   :  { %v1368_v26 = vadd.f32 %v1558_v24, %v1367_v25  ;;  %v1734_v27 = vpop.f32.mrb[37].mxu0 }
 0xedf   :  { %v1370_v28 = vpop.f32.mrb[38].mxu0 }
 0xee0   :  { %v1371_v29 = vadd.f32 %v1558_v24, %v1370_v28  ;;  %v1735_v30 = vpop.f32.mrb[39].mxu0  ;;  %v1374_v31 = vmax.f32 %v1368_v26, 0.0 }
 0xee2   :  { %v1375_v32 = vmax.f32 %v1371_v29, 0.0 }
 0xee4   :  { %v1376_v33 = vpack.c.bf16 %v1375_v32, %v1374_v31 }
 0xee6   :  { %1745 = vmatmul.mubr.msk.bf16.vlgmr.msra.gmra.mrb[36].mxu1 %vm1416_vm6, %v1376_v33 }
 0xfb9   :  { %v1454_v35 = vpop.f32.mrb[36].mxu1 }
 0xfba   :  { %v1455_v36 = vadd.f32 %v1562_v34, %v1454_v35  ;;  %v1746_v37 = vpop.f32.mrb[37].mxu1 }
 0xfbb   :  { %v1457_v38 = vpop.f32.mrb[38].mxu1 }
 0xfbc   :  { %v1458_v0 = vadd.f32 %v1562_v34, %v1457_v38  ;;  %v1747_v39 = vpop.f32.mrb[39].mxu1  ;;  %v1461_v40 = vadd.f32 %v1455_v36, %v1304_v19 }
 0xfbe   :  { %v1465_v41 = vsel %vm232_vm1, %v1461_v40, 0.0  ;;  %v1462_v42 = vadd.f32 %v1458_v0, %v1305_v20 }
 0xfbf   :  { %1466 = vadd.xlane.f32.xlu0 %v1465_v41 }
 0xfc0   :  { %v1468_v43 = vsel %vm232_vm1, %v1462_v42, 0.0 }
 0xfc1   :  { %1469 = vadd.xlane.f32.xlu1 %v1468_v43 }
0x104c   :  { %v1467_v45 = vpop.xlane.xlu0 %1466 }
0x104d   :  { %v1471_v46 = vmul.f32 0.03125, %v1467_v45 }
0x104e   :  { %v1470_v47 = vpop.xlane.xlu1 %1469 }
0x104f   :  { %v1473_v61 = vsub.f32 %v1461_v40, %v1471_v46  ;;  %v1472_v50 = vmul.f32 0.03125, %v1470_v47 }
0x1051   :  { %v1474_v51 = vsub.f32 %v1462_v42, %v1472_v50  ;;  %v1475_v57 = vmul.f32 %v1473_v61, %v1473_v61 }
0x1053   :  { %v1477_v52 = vsel %vm232_vm1, %v1475_v57, 0.0  ;;  %v1476_v53 = vmul.f32 %v1474_v51, %v1474_v51 }
0x1054   :  { %1478 = vadd.xlane.f32.xlu0 %v1477_v52 }
0x1055   :  { %v1480_v54 = vsel %vm232_vm1, %v1476_v53, 0.0 }
0x1056   :  { %1481 = vadd.xlane.f32.xlu1 %v1480_v54 }
0x10e1   :  { %v1479_v55 = vpop.xlane.xlu0 %1478 }
0x10e2   :  { %v1483_v56 = vmul.f32 0.03125, %v1479_v55 }
0x10e3   :  { %v1482_v58 = vpop.xlane.xlu1 %1481 }
0x10e4   :  { %v1485_v59 = vadd.f32 1e-05, %v1483_v56  ;;  %v1484_v60 = vmul.f32 0.03125, %v1482_v58 }
0x10e6   :  { %1841 = vrsqrt.f32 %v1485_v59  ;;  %v1486_v62 = vadd.f32 1e-05, %v1484_v60 }
0x10e8   :  { %1843 = vrsqrt.f32 %v1486_v62 }
0x10f0   :  { %v1842_v63 = vpop.eup %1841 }
0x10f1   :  { %v1489_v2 = vmul.f32 %v1842_v63, %v1473_v61 }
0x10f2   :  { %v1844_v3 = vpop.eup %1843 }
0x10f3   :  { %v1490_v4 = vmul.f32 %v1844_v3, %v1474_v51  ;;  %v1497_v44 = vmul.f32 %v1568_v1, %v1489_v2 }
0x10f5   :  { %v1498_v48 = vmul.f32 %v1568_v1, %v1490_v4  ;;  %v1505_v49 = vadd.f32 %v1569_v11, %v1497_v44 }
0x10f7   :  { %v1506_v5 = vadd.f32 %v1569_v11, %v1498_v48  ;;  %1507 = vst.msk [vmem:[#allocation23] sm:$0xff] %vm232_vm1, %v1505_v49 }
0x10f9   :  { %1508 = vst.msk [vmem:[#allocation23 + $0x8] sm:$0xff] %vm232_vm1, %v1506_v5 }
0x10fa   :  { %2142 = shalt.err (!%p2139_p10)
}
0x10fb   :  { %s2143_s28 = scalar_lea.hbm %s2653_s13, 256 }
0x10fc   :  { %p2144_p11 = scmp.ne.s32.totalorder %s2653_s13, %s2143_s28  ;;  %p2147_p12 = scmp.lt.u32.totalorder %s2143_s28, %s2653_s13 }
0x10fe   :  { %p2149_p13 = pnand %p2147_p12, %p2144_p11 }
0x1100   :  { %2152 = shalt.err (!%p2149_p13)
}
0x1101   :  { %1520 = dma.vmem_to_hbm [thread:$0]  %s1515_s8, 256, %s2653_s13, [#allocation4], %s2178_s11, %s2178_s11, %s2179_s22  }
0x1102   :  { %2167 = dma.done.wait [#allocation4], 256  }
0x1103   :  { %2168 = vsyncadd [#allocation4], 4294967040 }
0x1104   :  { %1524 = vsyncpa [#allocation3], 1 }
0x1105   :  { %1525 = vsyncpa [#allocation6], 1 }
0x1106   :  { %1526 = vsyncpa [#allocation9], 1 }
0x1107   :  { %1527 = vsyncpa [#allocation12], 1 }
0x1108   :  { %1528 = vsyncpa [#allocation15], 1 }
0x1109   :  { %1529 = vsyncpa [#allocation18], 1 }
0x110a   :  { %1530 = vsyncpa [#allocation21], 1 }
0x110b   :  { %1531 = vsyncpa [#allocation4], 1 }

</bundles_post_ra>
